<compile_context>
chip_gen: v7x
topology: tpu7x:2x2x1
jax: 0.10.0
libtpu: 0.0.40
codegen_flags: <defaults>
</compile_context>

<pallas_src>
import functools

import jax
import jax.numpy as jnp
from jax.experimental import pallas as pl
from jax.experimental.pallas import tpu as pltpu


def _layernorm(x, gamma, beta, eps):
    mu = jnp.mean(x, axis=-1, keepdims=True)
    var = jnp.mean((x - mu) * (x - mu), axis=-1, keepdims=True)
    return (x - mu) * jax.lax.rsqrt(var + eps) * gamma + beta


def _block_kernel(x_ref, ln1_g_ref, ln1_b_ref,
                  wqkv_ref, bqkv_ref, wproj_ref, bproj_ref,
                  ln2_g_ref, ln2_b_ref,
                  wfc1_ref, bfc1_ref, wfc2_ref, bfc2_ref,
                  o_ref,
                  qkv_scr,
                  *, num_heads, scale, eps):
    cdt = wqkv_ref.dtype          # matmul-operand dtype (f32 or bf16); accumulate in f32
    x = x_ref[...].astype(jnp.float32)                       # (N, C)
    dim = x.shape[-1]
    head_dim = dim // num_heads

    # ---- LayerNorm 1 + fused QKV projection (one big MXU matmul) ----
    xn = _layernorm(x, ln1_g_ref[...], ln1_b_ref[...], eps)
    qkv_scr[...] = jnp.dot(xn.astype(cdt), wqkv_ref[...],
                           preferred_element_type=jnp.float32) + bqkv_ref[...]

    # ---- Multi-head self-attention (unrolled over heads, f32 softmax) ----
    # Per-head context is folded directly into the output projection so no (N, C)
    # context scratch (and no lane-misaligned stores) is needed.
    attn_out = jnp.zeros((x.shape[0], dim), jnp.float32)
    for h in range(num_heads):
        lo = h * head_dim
        q = qkv_scr[:, lo:lo + head_dim] * scale                       # (N, hd)
        k = qkv_scr[:, dim + lo:dim + lo + head_dim]                   # (N, hd)
        v = qkv_scr[:, 2 * dim + lo:2 * dim + lo + head_dim]           # (N, hd)
        s = jax.lax.dot_general(q.astype(cdt), k.astype(cdt),
                                (((1,), (1,)), ((), ())),
                                preferred_element_type=jnp.float32)    # (N, N)
        s = s - jnp.max(s, axis=-1, keepdims=True)
        p = jnp.exp(s)
        p = p * pl.reciprocal(jnp.sum(p, axis=-1, keepdims=True), approx=False)
        ctx_h = jnp.dot(p.astype(cdt), v.astype(cdt),
                        preferred_element_type=jnp.float32)            # (N, hd)
        # fold into the output projection: ctx_h @ Wproj[lo:lo+hd, :]
        attn_out = attn_out + jnp.dot(ctx_h.astype(cdt),
                                      wproj_ref[lo:lo + head_dim, :],
                                      preferred_element_type=jnp.float32)

    attn_out = attn_out + bproj_ref[...]
    x1 = x + attn_out                                          # residual 1

    # ---- LayerNorm 2 + MLP (fc1 -> GELU(tanh) -> fc2) ----
    xn2 = _layernorm(x1, ln2_g_ref[...], ln2_b_ref[...], eps)
    hmid = jnp.dot(xn2.astype(cdt), wfc1_ref[...],
                   preferred_element_type=jnp.float32) + bfc1_ref[...]
    hmid = jax.nn.gelu(hmid, approximate=True)
    y = jnp.dot(hmid.astype(cdt), wfc2_ref[...],
                preferred_element_type=jnp.float32) + bfc2_ref[...]

    o_ref[...] = (x1 + y).astype(o_ref.dtype)                  # residual 2


def vit_block(x, params, *, num_heads, compute_dtype=jnp.float32, eps=1e-5):
    """x: (B, N, C). params use PyTorch nn.Linear layouts (out_features, in_features)."""
    B, N, C = x.shape
    H = params["w_fc1"].shape[0]
    head_dim = C // num_heads
    scale = head_dim ** (-0.5)
    f32 = jnp.float32

    # nn.Linear stores (out, in); transpose to (in, out) so the kernel does act @ W.
    # Weight matrices optionally cast to bf16 (v6e/v7x MXU fast path, halves weight DMA);
    # biases / LN params and all accumulation stay f32.
    w_qkv = params["w_qkv"].T.astype(compute_dtype)            # (C, 3C)
    w_proj = params["w_proj"].T.astype(compute_dtype)          # (C, C)
    w_fc1 = params["w_fc1"].T.astype(compute_dtype)            # (C, H)
    w_fc2 = params["w_fc2"].T.astype(compute_dtype)            # (H, C)
    # qkv bias = concat(q_bias, zeros_like(v_bias), v_bias), as in the PyTorch forward.
    b_qkv = jnp.concatenate(
        [params["q_bias"], jnp.zeros_like(params["v_bias"]), params["v_bias"]]
    ).astype(f32).reshape(1, 3 * C)
    b_proj = params["b_proj"].astype(f32).reshape(1, C)
    b_fc1 = params["b_fc1"].astype(f32).reshape(1, H)
    b_fc2 = params["b_fc2"].astype(f32).reshape(1, C)
    ln1_g = params["ln1_g"].astype(f32).reshape(1, C)
    ln1_b = params["ln1_b"].astype(f32).reshape(1, C)
    ln2_g = params["ln2_g"].astype(f32).reshape(1, C)
    ln2_b = params["ln2_b"].astype(f32).reshape(1, C)

    def const(shape):
        return pl.BlockSpec(shape, lambda b: (0,) * len(shape))

    seq_spec = pl.BlockSpec((pl.Squeezed(), N, C), lambda b: (b, 0, 0))

    operands = (x, ln1_g, ln1_b, w_qkv, b_qkv, w_proj, b_proj,
                ln2_g, ln2_b, w_fc1, b_fc1, w_fc2, b_fc2)

    nbytes = lambda a: int(a.size) * a.dtype.itemsize
    flops = B * (2 * N * C * 3 * C      # qkv projection
                 + 4 * N * N * C        # q@k^T and attn@v over all heads
                 + 2 * N * C * C        # output projection
                 + 4 * N * C * H)       # fc1 + fc2
    transcendentals = B * (num_heads * N * N + N * H)          # softmax exp + gelu tanh
    bytes_accessed = sum(nbytes(a) for a in operands) + nbytes(x)

    kernel = functools.partial(_block_kernel, num_heads=num_heads, scale=scale, eps=eps)

    return pl.pallas_call(
        kernel,
        out_shape=jax.ShapeDtypeStruct((B, N, C), x.dtype),
        grid_spec=pltpu.PrefetchScalarGridSpec(
            num_scalar_prefetch=0,
            grid=(B,),
            in_specs=[
                seq_spec,
                const((1, C)), const((1, C)),
                const((C, 3 * C)), const((1, 3 * C)),
                const((C, C)), const((1, C)),
                const((1, C)), const((1, C)),
                const((C, H)), const((1, H)),
                const((H, C)), const((1, C)),
            ],
            out_specs=seq_spec,
            scratch_shapes=[
                pltpu.VMEM((N, 3 * C), jnp.float32),   # qkv activations
            ],
        ),
        compiler_params=pltpu.CompilerParams(
            dimension_semantics=("parallel",),
            vmem_limit_bytes=32 * 1024 * 1024,
        ),
        cost_estimate=pl.CostEstimate(
            flops=flops, transcendentals=transcendentals, bytes_accessed=bytes_accessed),
    )(*operands)


def _block_ref(x, params, *, num_heads, eps=1e-5):
    """Pure-JAX transcription of the PyTorch Block.forward (gamma=None, eval mode)."""
    B, N, C = x.shape
    hd = C // num_heads
    scale = hd ** (-0.5)

    def ln(v, g, b):
        mu = v.mean(-1, keepdims=True)
        var = ((v - mu) ** 2).mean(-1, keepdims=True)
        return (v - mu) / jnp.sqrt(var + eps) * g + b

    xn = ln(x, params["ln1_g"], params["ln1_b"])
    qkv_bias = jnp.concatenate(
        [params["q_bias"], jnp.zeros_like(params["v_bias"]), params["v_bias"]])
    qkv = xn @ params["w_qkv"].T + qkv_bias
    qkv = qkv.reshape(B, N, 3, num_heads, hd).transpose(2, 0, 3, 1, 4)
    q, k, v = qkv[0] * scale, qkv[1], qkv[2]
    attn = q @ jnp.swapaxes(k, -2, -1)
    attn = jax.nn.softmax(attn, axis=-1)
    ctx = jnp.swapaxes(attn @ v, 1, 2).reshape(B, N, C)
    x = x + (ctx @ params["w_proj"].T + params["b_proj"])
    xn2 = ln(x, params["ln2_g"], params["ln2_b"])
    h = jax.nn.gelu(xn2 @ params["w_fc1"].T + params["b_fc1"], approximate=True)
    return x + (h @ params["w_fc2"].T + params["b_fc2"])


if __name__ == "__main__":
    # Small, lane-friendly config: batch=2, seq=16, dim=128 (multiple of 128),
    # num_heads=4 (head_dim=32), mlp_ratio=4 -> hidden=512.
    B, N, C = 2, 16, 128
    num_heads = 4
    H = 4 * C

    key = jax.random.PRNGKey(0)
    ks = jax.random.split(key, 14)
    rnd = lambda k, shape: jax.random.normal(k, shape, dtype=jnp.float32)

    x = rnd(ks[0], (B, N, C))
    params = dict(
        ln1_g=1.0 + 0.1 * rnd(ks[1], (C,)), ln1_b=0.1 * rnd(ks[2], (C,)),
        w_qkv=0.02 * rnd(ks[3], (3 * C, C)),
        q_bias=0.02 * rnd(ks[4], (C,)), v_bias=0.02 * rnd(ks[5], (C,)),
        w_proj=0.02 * rnd(ks[6], (C, C)), b_proj=0.02 * rnd(ks[7], (C,)),
        ln2_g=1.0 + 0.1 * rnd(ks[8], (C,)), ln2_b=0.1 * rnd(ks[9], (C,)),
        w_fc1=0.02 * rnd(ks[10], (H, C)), b_fc1=0.02 * rnd(ks[11], (H,)),
        w_fc2=0.02 * rnd(ks[12], (C, H)), b_fc2=0.02 * rnd(ks[13], (C,)),
    )

    ref = _block_ref(x, params, num_heads=num_heads)

    # f32 path (exact-ish check).
    out = jax.block_until_ready(vit_block(x, params, num_heads=num_heads))
    assert out.shape == (B, N, C)
    assert bool(jnp.allclose(out, ref, atol=5e-3, rtol=5e-3)), \
        float(jnp.max(jnp.abs(out - ref)))

    # bf16 MXU fast path (v6e/v7x): bf16 matmul inputs, f32 accumulation.
    out_bf16 = jax.block_until_ready(
        vit_block(x, params, num_heads=num_heads, compute_dtype=jnp.bfloat16))
    assert float(jnp.max(jnp.abs(out_bf16.astype(jnp.float32) - ref))) < 0.25

    print("KERNEL_OK")
</pallas_src>

<mosaic_0001>
module attributes {stable_mosaic.version = 11 : i64} {
  func.func @_block_kernel(%arg0: i32, %arg1: memref<1x16x128xf32, #tpu.memory_space<vmem>>, %arg2: memref<1x128xf32, #tpu.memory_space<vmem>>, %arg3: memref<1x128xf32, #tpu.memory_space<vmem>>, %arg4: memref<128x384xf32, #tpu.memory_space<vmem>>, %arg5: memref<1x384xf32, #tpu.memory_space<vmem>>, %arg6: memref<128x128xf32, #tpu.memory_space<vmem>>, %arg7: memref<1x128xf32, #tpu.memory_space<vmem>>, %arg8: memref<1x128xf32, #tpu.memory_space<vmem>>, %arg9: memref<1x128xf32, #tpu.memory_space<vmem>>, %arg10: memref<128x512xf32, #tpu.memory_space<vmem>>, %arg11: memref<1x512xf32, #tpu.memory_space<vmem>>, %arg12: memref<512x128xf32, #tpu.memory_space<vmem>>, %arg13: memref<1x128xf32, #tpu.memory_space<vmem>>, %arg14: memref<1x16x128xf32, #tpu.memory_space<vmem>>, %arg15: memref<16x384xf32, #tpu.memory_space<vmem>>) attributes {dimension_semantics = [#tpu.dimension_semantics<parallel>], iteration_bounds = array<i64: 2>, scalar_prefetch = 0 : i64, scratch_operands = 1 : i64, tpu.core_type = #tpu.core_type<tc>, window_params = [{transform_indices = @transform_0, window_bounds = array<i64: 1, 16, 128>}, {pipeline_mode = #tpu.pipeline_mode<synchronous>, transform_indices = @transform_1, window_bounds = array<i64: 1, 128>}, {pipeline_mode = #tpu.pipeline_mode<synchronous>, transform_indices = @transform_2, window_bounds = array<i64: 1, 128>}, {pipeline_mode = #tpu.pipeline_mode<synchronous>, transform_indices = @transform_3, window_bounds = array<i64: 128, 384>}, {pipeline_mode = #tpu.pipeline_mode<synchronous>, transform_indices = @transform_4, window_bounds = array<i64: 1, 384>}, {pipeline_mode = #tpu.pipeline_mode<synchronous>, transform_indices = @transform_5, window_bounds = array<i64: 128, 128>}, {pipeline_mode = #tpu.pipeline_mode<synchronous>, transform_indices = @transform_6, window_bounds = array<i64: 1, 128>}, {pipeline_mode = #tpu.pipeline_mode<synchronous>, transform_indices = @transform_7, window_bounds = array<i64: 1, 128>}, {pipeline_mode = #tpu.pipeline_mode<synchronous>, transform_indices = @transform_8, window_bounds = array<i64: 1, 128>}, {pipeline_mode = #tpu.pipeline_mode<synchronous>, transform_indices = @transform_9, window_bounds = array<i64: 128, 512>}, {pipeline_mode = #tpu.pipeline_mode<synchronous>, transform_indices = @transform_10, window_bounds = array<i64: 1, 512>}, {pipeline_mode = #tpu.pipeline_mode<synchronous>, transform_indices = @transform_11, window_bounds = array<i64: 512, 128>}, {pipeline_mode = #tpu.pipeline_mode<synchronous>, transform_indices = @transform_12, window_bounds = array<i64: 1, 128>}, {transform_indices = @transform_13, window_bounds = array<i64: 1, 16, 128>}]} {
    %c0 = arith.constant 0 : index
    %c0_0 = arith.constant 0 : index
    %c0_1 = arith.constant 0 : index
    %0 = vector.load %arg1[%c0, %c0_0, %c0_1] : memref<1x16x128xf32, #tpu.memory_space<vmem>>, vector<1x16x128xf32>
    %1 = vector.shape_cast %0 : vector<1x16x128xf32> to vector<16x128xf32>
    %c0_2 = arith.constant 0 : index
    %c0_3 = arith.constant 0 : index
    %2 = vector.load %arg2[%c0_2, %c0_3] : memref<1x128xf32, #tpu.memory_space<vmem>>, vector<1x128xf32>
    %c0_4 = arith.constant 0 : index
    %c0_5 = arith.constant 0 : index
    %3 = vector.load %arg3[%c0_4, %c0_5] : memref<1x128xf32, #tpu.memory_space<vmem>>, vector<1x128xf32>
    %cst = arith.constant dense<0.000000e+00> : vector<16xf32>
    %4 = vector.multi_reduction <add>, %1, %cst [1] : vector<16x128xf32> to vector<16xf32>
    %5 = vector.shape_cast %4 : vector<16xf32> to vector<16x1xf32>
    %cst_6 = arith.constant 1.280000e+02 : f32
    %6 = vector.broadcast %cst_6 : f32 to vector<16x1xf32>
    %7 = arith.divf %5, %6 : vector<16x1xf32>
    %8 = vector.broadcast %7 : vector<16x1xf32> to vector<16x128xf32>
    %9 = arith.subf %1, %8 : vector<16x128xf32>
    %10 = vector.broadcast %7 : vector<16x1xf32> to vector<16x128xf32>
    %11 = arith.subf %1, %10 : vector<16x128xf32>
    %12 = arith.mulf %9, %11 : vector<16x128xf32>
    %cst_7 = arith.constant dense<0.000000e+00> : vector<16xf32>
    %13 = vector.multi_reduction <add>, %12, %cst_7 [1] : vector<16x128xf32> to vector<16xf32>
    %14 = vector.shape_cast %13 : vector<16xf32> to vector<16x1xf32>
    %cst_8 = arith.constant 1.280000e+02 : f32
    %15 = vector.broadcast %cst_8 : f32 to vector<16x1xf32>
    %16 = arith.divf %14, %15 : vector<16x1xf32>
    %17 = vector.broadcast %7 : vector<16x1xf32> to vector<16x128xf32>
    %18 = arith.subf %1, %17 : vector<16x128xf32>
    %cst_9 = arith.constant 9.99999974E-6 : f32
    %19 = vector.broadcast %cst_9 : f32 to vector<16x1xf32>
    %20 = arith.addf %16, %19 : vector<16x1xf32>
    %21 = math.rsqrt %20 : vector<16x1xf32>
    %22 = vector.broadcast %21 : vector<16x1xf32> to vector<16x128xf32>
    %23 = arith.mulf %18, %22 : vector<16x128xf32>
    %24 = vector.broadcast %2 : vector<1x128xf32> to vector<16x128xf32>
    %25 = arith.mulf %23, %24 : vector<16x128xf32>
    %26 = vector.broadcast %3 : vector<1x128xf32> to vector<16x128xf32>
    %27 = arith.addf %25, %26 : vector<16x128xf32>
    %c0_10 = arith.constant 0 : index
    %c0_11 = arith.constant 0 : index
    %28 = vector.load %arg4[%c0_10, %c0_11] : memref<128x384xf32, #tpu.memory_space<vmem>>, vector<128x384xf32>
    %cst_12 = arith.constant dense<0.000000e+00> : vector<16x384xf32>
    %29 = tpu.matmul %27, %28, %cst_12 {dimension_numbers = #tpu.dot_dimension_numbers<[1], [0], [0], [1], [0, 0, 1, 1], [], []>} : vector<16x128xf32>, vector<128x384xf32>, vector<16x384xf32> -> vector<16x384xf32>
    %c0_13 = arith.constant 0 : index
    %c0_14 = arith.constant 0 : index
    %30 = vector.load %arg5[%c0_13, %c0_14] : memref<1x384xf32, #tpu.memory_space<vmem>>, vector<1x384xf32>
    %31 = vector.broadcast %30 : vector<1x384xf32> to vector<16x384xf32>
    %32 = arith.addf %29, %31 : vector<16x384xf32>
    %c0_15 = arith.constant 0 : index
    %c0_16 = arith.constant 0 : index
    %33 = vector.load %arg15[%c0_15, %c0_16] : memref<16x384xf32, #tpu.memory_space<vmem>>, vector<16x384xf32>
    tpu.vector_store %arg15[%c0_15, %c0_16], %32 {strides = array<i32>} : memref<16x384xf32, #tpu.memory_space<vmem>>, vector<16x384xf32>,
    %cst_17 = arith.constant 0.000000e+00 : f32
    %34 = vector.broadcast %cst_17 : f32 to vector<16x128xf32>
    %c0_18 = arith.constant 0 : index
    %c0_19 = arith.constant 0 : index
    %35 = vector.load %arg15[%c0_18, %c0_19] : memref<16x384xf32, #tpu.memory_space<vmem>>, vector<16x32xf32>
    %cst_20 = arith.constant 0.176776692 : f32
    %36 = vector.broadcast %cst_20 : f32 to vector<16x32xf32>
    %37 = arith.mulf %35, %36 : vector<16x32xf32>
    %c0_21 = arith.constant 0 : index
    %c128 = arith.constant 128 : index
    %38 = vector.load %arg15[%c0_21, %c128] : memref<16x384xf32, #tpu.memory_space<vmem>>, vector<16x32xf32>
    %c0_22 = arith.constant 0 : index
    %c256 = arith.constant 256 : index
    %39 = vector.load %arg15[%c0_22, %c256] : memref<16x384xf32, #tpu.memory_space<vmem>>, vector<16x32xf32>
    %cst_23 = arith.constant dense<0.000000e+00> : vector<16x16xf32>
    %40 = tpu.matmul %37, %38, %cst_23 {dimension_numbers = #tpu.dot_dimension_numbers<[1], [1], [0], [0], [0, 0, 1, 0], [], []>} : vector<16x32xf32>, vector<16x32xf32>, vector<16x16xf32> -> vector<16x16xf32>
    %cst_24 = arith.constant dense<0xFF800000> : vector<16xf32>
    %41 = vector.multi_reduction <maximumf>, %40, %cst_24 [1] : vector<16x16xf32> to vector<16xf32>
    %42 = vector.shape_cast %41 : vector<16xf32> to vector<16x1xf32>
    %43 = vector.broadcast %42 : vector<16x1xf32> to vector<16x16xf32>
    %44 = arith.subf %40, %43 : vector<16x16xf32>
    %45 = math.exp %44 : vector<16x16xf32>
    %cst_25 = arith.constant dense<0.000000e+00> : vector<16xf32>
    %46 = vector.multi_reduction <add>, %45, %cst_25 [1] : vector<16x16xf32> to vector<16xf32>
    %47 = vector.shape_cast %46 : vector<16xf32> to vector<16x1xf32>
    %48 = tpu.reciprocal %47 : vector<16x1xf32> -> vector<16x1xf32>
    %49 = vector.broadcast %48 : vector<16x1xf32> to vector<16x16xf32>
    %50 = arith.mulf %45, %49 : vector<16x16xf32>
    %cst_26 = arith.constant dense<0.000000e+00> : vector<16x32xf32>
    %51 = tpu.matmul %50, %39, %cst_26 {dimension_numbers = #tpu.dot_dimension_numbers<[1], [0], [0], [1], [0, 0, 1, 1], [], []>} : vector<16x16xf32>, vector<16x32xf32>, vector<16x32xf32> -> vector<16x32xf32>
    %c0_27 = arith.constant 0 : index
    %c0_28 = arith.constant 0 : index
    %52 = vector.load %arg6[%c0_27, %c0_28] : memref<128x128xf32, #tpu.memory_space<vmem>>, vector<32x128xf32>
    %cst_29 = arith.constant dense<0.000000e+00> : vector<16x128xf32>
    %53 = tpu.matmul %51, %52, %cst_29 {dimension_numbers = #tpu.dot_dimension_numbers<[1], [0], [0], [1], [0, 0, 1, 1], [], []>} : vector<16x32xf32>, vector<32x128xf32>, vector<16x128xf32> -> vector<16x128xf32>
    %54 = arith.addf %34, %53 : vector<16x128xf32>
    %c0_30 = arith.constant 0 : index
    %c32 = arith.constant 32 : index
    %55 = vector.load %arg15[%c0_30, %c32] : memref<16x384xf32, #tpu.memory_space<vmem>>, vector<16x32xf32>
    %cst_31 = arith.constant 0.176776692 : f32
    %56 = vector.broadcast %cst_31 : f32 to vector<16x32xf32>
    %57 = arith.mulf %55, %56 : vector<16x32xf32>
    %c0_32 = arith.constant 0 : index
    %c160 = arith.constant 160 : index
    %58 = vector.load %arg15[%c0_32, %c160] : memref<16x384xf32, #tpu.memory_space<vmem>>, vector<16x32xf32>
    %c0_33 = arith.constant 0 : index
    %c288 = arith.constant 288 : index
    %59 = vector.load %arg15[%c0_33, %c288] : memref<16x384xf32, #tpu.memory_space<vmem>>, vector<16x32xf32>
    %cst_34 = arith.constant dense<0.000000e+00> : vector<16x16xf32>
    %60 = tpu.matmul %57, %58, %cst_34 {dimension_numbers = #tpu.dot_dimension_numbers<[1], [1], [0], [0], [0, 0, 1, 0], [], []>} : vector<16x32xf32>, vector<16x32xf32>, vector<16x16xf32> -> vector<16x16xf32>
    %cst_35 = arith.constant dense<0xFF800000> : vector<16xf32>
    %61 = vector.multi_reduction <maximumf>, %60, %cst_35 [1] : vector<16x16xf32> to vector<16xf32>
    %62 = vector.shape_cast %61 : vector<16xf32> to vector<16x1xf32>
    %63 = vector.broadcast %62 : vector<16x1xf32> to vector<16x16xf32>
    %64 = arith.subf %60, %63 : vector<16x16xf32>
    %65 = math.exp %64 : vector<16x16xf32>
    %cst_36 = arith.constant dense<0.000000e+00> : vector<16xf32>
    %66 = vector.multi_reduction <add>, %65, %cst_36 [1] : vector<16x16xf32> to vector<16xf32>
    %67 = vector.shape_cast %66 : vector<16xf32> to vector<16x1xf32>
    %68 = tpu.reciprocal %67 : vector<16x1xf32> -> vector<16x1xf32>
    %69 = vector.broadcast %68 : vector<16x1xf32> to vector<16x16xf32>
    %70 = arith.mulf %65, %69 : vector<16x16xf32>
    %cst_37 = arith.constant dense<0.000000e+00> : vector<16x32xf32>
    %71 = tpu.matmul %70, %59, %cst_37 {dimension_numbers = #tpu.dot_dimension_numbers<[1], [0], [0], [1], [0, 0, 1, 1], [], []>} : vector<16x16xf32>, vector<16x32xf32>, vector<16x32xf32> -> vector<16x32xf32>
    %c32_38 = arith.constant 32 : index
    %c0_39 = arith.constant 0 : index
    %72 = vector.load %arg6[%c32_38, %c0_39] : memref<128x128xf32, #tpu.memory_space<vmem>>, vector<32x128xf32>
    %cst_40 = arith.constant dense<0.000000e+00> : vector<16x128xf32>
    %73 = tpu.matmul %71, %72, %cst_40 {dimension_numbers = #tpu.dot_dimension_numbers<[1], [0], [0], [1], [0, 0, 1, 1], [], []>} : vector<16x32xf32>, vector<32x128xf32>, vector<16x128xf32> -> vector<16x128xf32>
    %74 = arith.addf %54, %73 : vector<16x128xf32>
    %c0_41 = arith.constant 0 : index
    %c64 = arith.constant 64 : index
    %75 = vector.load %arg15[%c0_41, %c64] : memref<16x384xf32, #tpu.memory_space<vmem>>, vector<16x32xf32>
    %cst_42 = arith.constant 0.176776692 : f32
    %76 = vector.broadcast %cst_42 : f32 to vector<16x32xf32>
    %77 = arith.mulf %75, %76 : vector<16x32xf32>
    %c0_43 = arith.constant 0 : index
    %c192 = arith.constant 192 : index
    %78 = vector.load %arg15[%c0_43, %c192] : memref<16x384xf32, #tpu.memory_space<vmem>>, vector<16x32xf32>
    %c0_44 = arith.constant 0 : index
    %c320 = arith.constant 320 : index
    %79 = vector.load %arg15[%c0_44, %c320] : memref<16x384xf32, #tpu.memory_space<vmem>>, vector<16x32xf32>
    %cst_45 = arith.constant dense<0.000000e+00> : vector<16x16xf32>
    %80 = tpu.matmul %77, %78, %cst_45 {dimension_numbers = #tpu.dot_dimension_numbers<[1], [1], [0], [0], [0, 0, 1, 0], [], []>} : vector<16x32xf32>, vector<16x32xf32>, vector<16x16xf32> -> vector<16x16xf32>
    %cst_46 = arith.constant dense<0xFF800000> : vector<16xf32>
    %81 = vector.multi_reduction <maximumf>, %80, %cst_46 [1] : vector<16x16xf32> to vector<16xf32>
    %82 = vector.shape_cast %81 : vector<16xf32> to vector<16x1xf32>
    %83 = vector.broadcast %82 : vector<16x1xf32> to vector<16x16xf32>
    %84 = arith.subf %80, %83 : vector<16x16xf32>
    %85 = math.exp %84 : vector<16x16xf32>
    %cst_47 = arith.constant dense<0.000000e+00> : vector<16xf32>
    %86 = vector.multi_reduction <add>, %85, %cst_47 [1] : vector<16x16xf32> to vector<16xf32>
    %87 = vector.shape_cast %86 : vector<16xf32> to vector<16x1xf32>
    %88 = tpu.reciprocal %87 : vector<16x1xf32> -> vector<16x1xf32>
    %89 = vector.broadcast %88 : vector<16x1xf32> to vector<16x16xf32>
    %90 = arith.mulf %85, %89 : vector<16x16xf32>
    %cst_48 = arith.constant dense<0.000000e+00> : vector<16x32xf32>
    %91 = tpu.matmul %90, %79, %cst_48 {dimension_numbers = #tpu.dot_dimension_numbers<[1], [0], [0], [1], [0, 0, 1, 1], [], []>} : vector<16x16xf32>, vector<16x32xf32>, vector<16x32xf32> -> vector<16x32xf32>
    %c64_49 = arith.constant 64 : index
    %c0_50 = arith.constant 0 : index
    %92 = vector.load %arg6[%c64_49, %c0_50] : memref<128x128xf32, #tpu.memory_space<vmem>>, vector<32x128xf32>
    %cst_51 = arith.constant dense<0.000000e+00> : vector<16x128xf32>
    %93 = tpu.matmul %91, %92, %cst_51 {dimension_numbers = #tpu.dot_dimension_numbers<[1], [0], [0], [1], [0, 0, 1, 1], [], []>} : vector<16x32xf32>, vector<32x128xf32>, vector<16x128xf32> -> vector<16x128xf32>
    %94 = arith.addf %74, %93 : vector<16x128xf32>
    %c0_52 = arith.constant 0 : index
    %c96 = arith.constant 96 : index
    %95 = vector.load %arg15[%c0_52, %c96] : memref<16x384xf32, #tpu.memory_space<vmem>>, vector<16x32xf32>
    %cst_53 = arith.constant 0.176776692 : f32
    %96 = vector.broadcast %cst_53 : f32 to vector<16x32xf32>
    %97 = arith.mulf %95, %96 : vector<16x32xf32>
    %c0_54 = arith.constant 0 : index
    %c224 = arith.constant 224 : index
    %98 = vector.load %arg15[%c0_54, %c224] : memref<16x384xf32, #tpu.memory_space<vmem>>, vector<16x32xf32>
    %c0_55 = arith.constant 0 : index
    %c352 = arith.constant 352 : index
    %99 = vector.load %arg15[%c0_55, %c352] : memref<16x384xf32, #tpu.memory_space<vmem>>, vector<16x32xf32>
    %cst_56 = arith.constant dense<0.000000e+00> : vector<16x16xf32>
    %100 = tpu.matmul %97, %98, %cst_56 {dimension_numbers = #tpu.dot_dimension_numbers<[1], [1], [0], [0], [0, 0, 1, 0], [], []>} : vector<16x32xf32>, vector<16x32xf32>, vector<16x16xf32> -> vector<16x16xf32>
    %cst_57 = arith.constant dense<0xFF800000> : vector<16xf32>
    %101 = vector.multi_reduction <maximumf>, %100, %cst_57 [1] : vector<16x16xf32> to vector<16xf32>
    %102 = vector.shape_cast %101 : vector<16xf32> to vector<16x1xf32>
    %103 = vector.broadcast %102 : vector<16x1xf32> to vector<16x16xf32>
    %104 = arith.subf %100, %103 : vector<16x16xf32>
    %105 = math.exp %104 : vector<16x16xf32>
    %cst_58 = arith.constant dense<0.000000e+00> : vector<16xf32>
    %106 = vector.multi_reduction <add>, %105, %cst_58 [1] : vector<16x16xf32> to vector<16xf32>
    %107 = vector.shape_cast %106 : vector<16xf32> to vector<16x1xf32>
    %108 = tpu.reciprocal %107 : vector<16x1xf32> -> vector<16x1xf32>
    %109 = vector.broadcast %108 : vector<16x1xf32> to vector<16x16xf32>
    %110 = arith.mulf %105, %109 : vector<16x16xf32>
    %cst_59 = arith.constant dense<0.000000e+00> : vector<16x32xf32>
    %111 = tpu.matmul %110, %99, %cst_59 {dimension_numbers = #tpu.dot_dimension_numbers<[1], [0], [0], [1], [0, 0, 1, 1], [], []>} : vector<16x16xf32>, vector<16x32xf32>, vector<16x32xf32> -> vector<16x32xf32>
    %c96_60 = arith.constant 96 : index
    %c0_61 = arith.constant 0 : index
    %112 = vector.load %arg6[%c96_60, %c0_61] : memref<128x128xf32, #tpu.memory_space<vmem>>, vector<32x128xf32>
    %cst_62 = arith.constant dense<0.000000e+00> : vector<16x128xf32>
    %113 = tpu.matmul %111, %112, %cst_62 {dimension_numbers = #tpu.dot_dimension_numbers<[1], [0], [0], [1], [0, 0, 1, 1], [], []>} : vector<16x32xf32>, vector<32x128xf32>, vector<16x128xf32> -> vector<16x128xf32>
    %114 = arith.addf %94, %113 : vector<16x128xf32>
    %c0_63 = arith.constant 0 : index
    %c0_64 = arith.constant 0 : index
    %115 = vector.load %arg7[%c0_63, %c0_64] : memref<1x128xf32, #tpu.memory_space<vmem>>, vector<1x128xf32>
    %116 = vector.broadcast %115 : vector<1x128xf32> to vector<16x128xf32>
    %117 = arith.addf %114, %116 : vector<16x128xf32>
    %118 = arith.addf %1, %117 : vector<16x128xf32>
    %c0_65 = arith.constant 0 : index
    %c0_66 = arith.constant 0 : index
    %119 = vector.load %arg8[%c0_65, %c0_66] : memref<1x128xf32, #tpu.memory_space<vmem>>, vector<1x128xf32>
    %c0_67 = arith.constant 0 : index
    %c0_68 = arith.constant 0 : index
    %120 = vector.load %arg9[%c0_67, %c0_68] : memref<1x128xf32, #tpu.memory_space<vmem>>, vector<1x128xf32>
    %cst_69 = arith.constant dense<0.000000e+00> : vector<16xf32>
    %121 = vector.multi_reduction <add>, %118, %cst_69 [1] : vector<16x128xf32> to vector<16xf32>
    %122 = vector.shape_cast %121 : vector<16xf32> to vector<16x1xf32>
    %cst_70 = arith.constant 1.280000e+02 : f32
    %123 = vector.broadcast %cst_70 : f32 to vector<16x1xf32>
    %124 = arith.divf %122, %123 : vector<16x1xf32>
    %125 = vector.broadcast %124 : vector<16x1xf32> to vector<16x128xf32>
    %126 = arith.subf %118, %125 : vector<16x128xf32>
    %127 = vector.broadcast %124 : vector<16x1xf32> to vector<16x128xf32>
    %128 = arith.subf %118, %127 : vector<16x128xf32>
    %129 = arith.mulf %126, %128 : vector<16x128xf32>
    %cst_71 = arith.constant dense<0.000000e+00> : vector<16xf32>
    %130 = vector.multi_reduction <add>, %129, %cst_71 [1] : vector<16x128xf32> to vector<16xf32>
    %131 = vector.shape_cast %130 : vector<16xf32> to vector<16x1xf32>
    %cst_72 = arith.constant 1.280000e+02 : f32
    %132 = vector.broadcast %cst_72 : f32 to vector<16x1xf32>
    %133 = arith.divf %131, %132 : vector<16x1xf32>
    %134 = vector.broadcast %124 : vector<16x1xf32> to vector<16x128xf32>
    %135 = arith.subf %118, %134 : vector<16x128xf32>
    %cst_73 = arith.constant 9.99999974E-6 : f32
    %136 = vector.broadcast %cst_73 : f32 to vector<16x1xf32>
    %137 = arith.addf %133, %136 : vector<16x1xf32>
    %138 = math.rsqrt %137 : vector<16x1xf32>
    %139 = vector.broadcast %138 : vector<16x1xf32> to vector<16x128xf32>
    %140 = arith.mulf %135, %139 : vector<16x128xf32>
    %141 = vector.broadcast %119 : vector<1x128xf32> to vector<16x128xf32>
    %142 = arith.mulf %140, %141 : vector<16x128xf32>
    %143 = vector.broadcast %120 : vector<1x128xf32> to vector<16x128xf32>
    %144 = arith.addf %142, %143 : vector<16x128xf32>
    %c0_74 = arith.constant 0 : index
    %c0_75 = arith.constant 0 : index
    %145 = vector.load %arg10[%c0_74, %c0_75] : memref<128x512xf32, #tpu.memory_space<vmem>>, vector<128x512xf32>
    %cst_76 = arith.constant dense<0.000000e+00> : vector<16x512xf32>
    %146 = tpu.matmul %144, %145, %cst_76 {dimension_numbers = #tpu.dot_dimension_numbers<[1], [0], [0], [1], [0, 0, 1, 1], [], []>} : vector<16x128xf32>, vector<128x512xf32>, vector<16x512xf32> -> vector<16x512xf32>
    %c0_77 = arith.constant 0 : index
    %c0_78 = arith.constant 0 : index
    %147 = vector.load %arg11[%c0_77, %c0_78] : memref<1x512xf32, #tpu.memory_space<vmem>>, vector<1x512xf32>
    %148 = vector.broadcast %147 : vector<1x512xf32> to vector<16x512xf32>
    %149 = arith.addf %146, %148 : vector<16x512xf32>
    %150 = arith.mulf %149, %149 : vector<16x512xf32>
    %151 = arith.mulf %149, %150 : vector<16x512xf32>
    %cst_79 = arith.constant 4.471500e-02 : f32
    %152 = vector.broadcast %cst_79 : f32 to vector<16x512xf32>
    %153 = arith.mulf %152, %151 : vector<16x512xf32>
    %154 = arith.addf %149, %153 : vector<16x512xf32>
    %cst_80 = arith.constant 0.797884583 : f32
    %155 = vector.broadcast %cst_80 : f32 to vector<16x512xf32>
    %156 = arith.mulf %155, %154 : vector<16x512xf32>
    %157 = math.tanh %156 : vector<16x512xf32>
    %cst_81 = arith.constant 1.000000e+00 : f32
    %158 = vector.broadcast %cst_81 : f32 to vector<16x512xf32>
    %159 = arith.addf %158, %157 : vector<16x512xf32>
    %cst_82 = arith.constant 5.000000e-01 : f32
    %160 = vector.broadcast %cst_82 : f32 to vector<16x512xf32>
    %161 = arith.mulf %160, %159 : vector<16x512xf32>
    %162 = arith.mulf %149, %161 : vector<16x512xf32>
    %c0_83 = arith.constant 0 : index
    %c0_84 = arith.constant 0 : index
    %163 = vector.load %arg12[%c0_83, %c0_84] : memref<512x128xf32, #tpu.memory_space<vmem>>, vector<512x128xf32>
    %cst_85 = arith.constant dense<0.000000e+00> : vector<16x128xf32>
    %164 = tpu.matmul %162, %163, %cst_85 {dimension_numbers = #tpu.dot_dimension_numbers<[1], [0], [0], [1], [0, 0, 1, 1], [], []>} : vector<16x512xf32>, vector<512x128xf32>, vector<16x128xf32> -> vector<16x128xf32>
    %c0_86 = arith.constant 0 : index
    %c0_87 = arith.constant 0 : index
    %165 = vector.load %arg13[%c0_86, %c0_87] : memref<1x128xf32, #tpu.memory_space<vmem>>, vector<1x128xf32>
    %166 = vector.broadcast %165 : vector<1x128xf32> to vector<16x128xf32>
    %167 = arith.addf %164, %166 : vector<16x128xf32>
    %168 = arith.addf %118, %167 : vector<16x128xf32>
    %c0_88 = arith.constant 0 : index
    %c0_89 = arith.constant 0 : index
    %c0_90 = arith.constant 0 : index
    %169 = vector.load %arg14[%c0_88, %c0_89, %c0_90] : memref<1x16x128xf32, #tpu.memory_space<vmem>>, vector<1x16x128xf32>
    %170 = vector.shape_cast %169 : vector<1x16x128xf32> to vector<16x128xf32>
    %171 = vector.shape_cast %168 : vector<16x128xf32> to vector<1x16x128xf32>
    tpu.vector_store %arg14[%c0_88, %c0_89, %c0_90], %171 {strides = array<i32>} : memref<1x16x128xf32, #tpu.memory_space<vmem>>, vector<1x16x128xf32>,
    return
  }
  func.func @transform_0(%arg0: i32) -> (i32, i32, i32) {
    %c0_i32 = arith.constant 0 : i32
    %c0_i32_0 = arith.constant 0 : i32
    %c0_i32_1 = arith.constant 0 : i32
    return %arg0, %c0_i32, %c0_i32_0 : i32, i32, i32
  }
  func.func @transform_1(%arg0: i32) -> (i32, i32) {
    %c0_i32 = arith.constant 0 : i32
    %c0_i32_0 = arith.constant 0 : i32
    %c0_i32_1 = arith.constant 0 : i32
    return %c0_i32, %c0_i32_0 : i32, i32
  }
  func.func @transform_2(%arg0: i32) -> (i32, i32) {
    %c0_i32 = arith.constant 0 : i32
    %c0_i32_0 = arith.constant 0 : i32
    %c0_i32_1 = arith.constant 0 : i32
    return %c0_i32, %c0_i32_0 : i32, i32
  }
  func.func @transform_3(%arg0: i32) -> (i32, i32) {
    %c0_i32 = arith.constant 0 : i32
    %c0_i32_0 = arith.constant 0 : i32
    %c0_i32_1 = arith.constant 0 : i32
    return %c0_i32, %c0_i32_0 : i32, i32
  }
  func.func @transform_4(%arg0: i32) -> (i32, i32) {
    %c0_i32 = arith.constant 0 : i32
    %c0_i32_0 = arith.constant 0 : i32
    %c0_i32_1 = arith.constant 0 : i32
    return %c0_i32, %c0_i32_0 : i32, i32
  }
  func.func @transform_5(%arg0: i32) -> (i32, i32) {
    %c0_i32 = arith.constant 0 : i32
    %c0_i32_0 = arith.constant 0 : i32
    %c0_i32_1 = arith.constant 0 : i32
    return %c0_i32, %c0_i32_0 : i32, i32
  }
  func.func @transform_6(%arg0: i32) -> (i32, i32) {
    %c0_i32 = arith.constant 0 : i32
    %c0_i32_0 = arith.constant 0 : i32
    %c0_i32_1 = arith.constant 0 : i32
    return %c0_i32, %c0_i32_0 : i32, i32
  }
  func.func @transform_7(%arg0: i32) -> (i32, i32) {
    %c0_i32 = arith.constant 0 : i32
    %c0_i32_0 = arith.constant 0 : i32
    %c0_i32_1 = arith.constant 0 : i32
    return %c0_i32, %c0_i32_0 : i32, i32
  }
  func.func @transform_8(%arg0: i32) -> (i32, i32) {
    %c0_i32 = arith.constant 0 : i32
    %c0_i32_0 = arith.constant 0 : i32
    %c0_i32_1 = arith.constant 0 : i32
    return %c0_i32, %c0_i32_0 : i32, i32
  }
  func.func @transform_9(%arg0: i32) -> (i32, i32) {
    %c0_i32 = arith.constant 0 : i32
    %c0_i32_0 = arith.constant 0 : i32
    %c0_i32_1 = arith.constant 0 : i32
    return %c0_i32, %c0_i32_0 : i32, i32
  }
  func.func @transform_10(%arg0: i32) -> (i32, i32) {
    %c0_i32 = arith.constant 0 : i32
    %c0_i32_0 = arith.constant 0 : i32
    %c0_i32_1 = arith.constant 0 : i32
    return %c0_i32, %c0_i32_0 : i32, i32
  }
  func.func @transform_11(%arg0: i32) -> (i32, i32) {
    %c0_i32 = arith.constant 0 : i32
    %c0_i32_0 = arith.constant 0 : i32
    %c0_i32_1 = arith.constant 0 : i32
    return %c0_i32, %c0_i32_0 : i32, i32
  }
  func.func @transform_12(%arg0: i32) -> (i32, i32) {
    %c0_i32 = arith.constant 0 : i32
    %c0_i32_0 = arith.constant 0 : i32
    %c0_i32_1 = arith.constant 0 : i32
    return %c0_i32, %c0_i32_0 : i32, i32
  }
  func.func @transform_13(%arg0: i32) -> (i32, i32, i32) {
    %c0_i32 = arith.constant 0 : i32
    %c0_i32_0 = arith.constant 0 : i32
    %c0_i32_1 = arith.constant 0 : i32
    return %arg0, %c0_i32, %c0_i32_0 : i32, i32, i32
  }
}

</mosaic_0001>

<bundles_post_ra>
// kernel: tpu_custom_call.1
= control target key start
LH: loop header
LB: loop body
LE: loop exit
PB: predicated region body
PF: predicated region fallthrough
CT: control target
= control target key end

     0   :  { %s4459_s0 = inlined_call_operand.hbm [shape: f32[2,16,128], index: 0, kind: input, shape index: {}]   ;;  %s4460_s1 = inlined_call_operand.hbm [shape: f32[1,128], index: 1, kind: input, shape index: {}]   ;;  %s4461_s2 = inlined_call_operand.hbm [shape: f32[1,128], index: 2, kind: input, shape index: {}]   ;;  %s4462_s3 = inlined_call_operand.hbm [shape: f32[128,384], index: 3, kind: input, shape index: {}]   ;;  %s4463_s4 = inlined_call_operand.vmem [shape: f32[1,384], index: 4, kind: input, shape index: {}]   ;;  %s4464_s5 = inlined_call_operand.hbm [shape: f32[128,128], index: 5, kind: input, shape index: {}]   ;;  %s4465_s6 = inlined_call_operand.vmem [shape: f32[1,128], index: 6, kind: input, shape index: {}]   ;;  %s4466_s7 = inlined_call_operand.vmem [shape: f32[1,128], index: 7, kind: input, shape index: {}]   ;;  %s4467_s8 = inlined_call_operand.vmem [shape: f32[1,128], index: 8, kind: input, shape index: {}]   ;;  %s4468_s9 = inlined_call_operand.hbm [shape: f32[128,512], index: 9, kind: input, shape index: {}]   ;;  %s4469_s10 = inlined_call_operand.vmem [shape: f32[1,512], index: 10, kind: input, shape index: {}]   ;;  %s4470_s11 = inlined_call_operand.hbm [shape: f32[512,128], index: 11, kind: input, shape index: {}]   ;;  %s4471_s12 = inlined_call_operand.vmem [shape: f32[1,128], index: 12, kind: input, shape index: {}]   ;;  %s4472_s13 = inlined_call_operand.hbm [shape: f32[2,16,128], index: 13, kind: output, shape index: {}]  }
   0x1   :  { %4477 = sst [smem:[#allocation21_spill]] %s4460_s1 }
   0x2   :  { %4478 = sst [smem:[#allocation22_spill]] %s4462_s3 }
   0x3   :  { %4479 = sst [smem:[#allocation23_spill]] %s4466_s7 }
   0x4   :  { %4480 = sst [smem:[#allocation24_spill]] %s4467_s8 }
   0x5   :  { %4481 = sst [smem:[#allocation25_spill]] %s4469_s10 }
   0x6   :  { %4482 = sst [smem:[#allocation26_spill]] %s4471_s12 }
   0x7   :  { %4483 = sst [smem:[#allocation27_spill]] %s4472_s13 }
   0x8   :  { %18 = vsyncpa [#allocation4], 0 }
   0x9   :  { %20 = vsyncpa [#allocation4 + $0x1], 0 }
   0xa   :  { %21 = vsyncpa [#allocation7], 0 }
   0xb   :  { %22 = vsyncpa [#allocation10], 0 }
   0xc   :  { %23 = vsyncpa [#allocation13], 0 }
   0xd   :  { %24 = vsyncpa [#allocation5], 0 }
   0xe   :  { %26 = vsyncpa [#allocation5 + $0x1], 0  ;;  %s3880_s25 = smov 0   ;;  %s3882_s26 = smov 0  }
   0xf   :  { %s3884_s27 = smov 0   ;;  %s3886_s28 = smov 0  }
  0x10 LB: > { %s3790_s29 = smov [#allocation6]   ;;  %s3901_s14 = sadd.s32 4294967295, %s3788_s28   ;;  %s3788_s28 = sphi %s3886_s28, %s4515_s28   ;;  %s3784_s27 = sphi %s3884_s27, %s4514_s27   ;;  %s3780_s26 = sphi %s3882_s26, %s4513_s26   ;;  %s3776_s25 = sphi %s3880_s25, %s4512_s25  }
  0x11   : > { %s354_s30 = sshll.u32 %s3790_s29, 4  ;;  %p2687_p0 = scmp.ge.s32.totalorder %s3788_s28, 1  ;;  %s3906_s30 = int_to_ptr.vmem [resolvable:$true] %s354_s30 }
  0x12   : > { %p4474_p1 = scmp.eq.s32.totalorder %s3901_s14, 0  ;;  %p341_p2 = scmp.lt.s32.totalorder %s3788_s28, 3 }
  0x13   : > { %s3791_s16 = smov [#allocation9]   ;;  %s3792_s19 = smov [#allocation12]  }
  0x14   : > { %p3908_p3 = pnand %p2687_p0, %p341_p2  ;;  %s375_s17 = sshll.u32 %s3791_s16, 4  ;;  %s3915_s17 = int_to_ptr.vmem [resolvable:$true] %s375_s17 }
  0x15   : > { %s413_s20 = sshll.u32 %s3792_s19, 4  ;;  %s4486_s1 = sld [smem:[#allocation21_spill]]  ;;  %s3923_s20 = int_to_ptr.vmem [resolvable:$true] %s413_s20 }
  0x16   : > { %s4484_s15 = scalar_select %p3908_p3, 1, 0 }
  0x17   : > { %p3335_p5 = pneg %p3908_p3 }
  0x19   : > { %p3919_p6 = pnand %p3335_p5, %p4474_p1 }
  0x1b   : > { %s3512_s23 = scalar_lea.hbm %s4486_s1, 16  ;;  %p3933_p8 = pneg %p3919_p6 }
  0x1c   : > { %p3513_p7 = scmp.ne.s32.totalorder %s4486_s1, %s3512_s23  ;;  %p3519_p11 = scmp.lt.u32.totalorder %s3512_s23, %s4486_s1 }
  0x1e   : > { %p3515_p9 = pnand %p3933_p8, %p3513_p7 }
  0x20   : > { %p3516_p10 = pneg %p3515_p9 }
  0x22   : > { %p3521_p12 = pnand %p3519_p11, %p3516_p10 }
  0x24   : > { %3524 = shalt.err (!%p3521_p12)
}
  0x25   : > { %s3525_s21 = scalar_lea.vmem %s3906_s30, 16  ;;  %s3532_s22 = scalar_lea.vmem %s3906_s30, 32 }
  0x26   : > { %p3526_p13 = scmp.ne.s32.totalorder %s3906_s30, %s3525_s21  ;;  %p3533_p5 = scmp.lt.s32.totalorder %s3906_s30, %s3906_s30 }
  0x27   : > { %p3534_p7 = scmp.lt.s32.totalorder %s3532_s22, %s3525_s21 }
  0x28   : > { %p3528_p0 = pnand %p3526_p13, %p3933_p8 }
  0x29   : > { %p3535_p9 = por %p3534_p7, %p3533_p5 }
  0x2a   : > { %p3529_p2 = pneg %p3528_p0 }
  0x2c   : > { %p3536_p4 = pnand %p3535_p9, %p3529_p2 }
  0x2e   : > { %3539 = shalt.err (!%p3536_p4)
}
  0x2f   : > { %3338 = dma.hbm_to_vmem [thread:$0]  (!%p3919_p6), %s4486_s1, 16, %s3906_s30, [#allocation7]  }
  0x30   : > { %s4488_s3 = sld [smem:[#allocation22_spill]] }
  0x36   : > { %s3540_s19 = scalar_lea.hbm %s4488_s3, 6144 }
  0x37   : > { %p3541_p10 = scmp.ne.s32.totalorder %s4488_s3, %s3540_s19  ;;  %p3547_p4 = scmp.lt.u32.totalorder %s3540_s19, %s4488_s3 }
  0x39   : > { %p3543_p11 = pnand %p3541_p10, %p3933_p8 }
  0x3b   : > { %p3544_p12 = pneg %p3543_p11 }
  0x3d   : > { %p3549_p13 = pnand %p3547_p4, %p3544_p12 }
  0x3f   : > { %3552 = shalt.err (!%p3549_p13)
}
  0x40   : > { %s3553_s30 = scalar_lea.vmem %s3915_s17, 6144  ;;  %p3561_p7 = scmp.lt.s32.totalorder %s3915_s17, %s3915_s17 }
  0x41   : > { %p3554_p0 = scmp.ne.s32.totalorder %s3915_s17, %s3553_s30  ;;  %p3562_p9 = scmp.lt.s32.totalorder %s3553_s30, %s3553_s30 }
  0x43   : > { %p3556_p2 = pnand %p3554_p0, %p3933_p8  ;;  %p3563_p10 = por %p3562_p9, %p3561_p7 }
  0x45   : > { %p3557_p5 = pneg %p3556_p2 }
  0x47   : > { %p3564_p11 = pnand %p3563_p10, %p3557_p5 }
  0x49   : > { %3567 = shalt.err (!%p3564_p11)
}
  0x4a   : > { %s3793_s10 = smov 384   ;;  %s3794_s12 = smov 24  }
  0x4b   : > { %3344 = dma.hbm_to_vmem [thread:$0]  (!%p3919_p6), %s4488_s3, 6144, %s3915_s17, [#allocation10], %s3793_s10, %s3793_s10, %s3794_s12  }
  0x4c   : > { %s3568_s19 = scalar_lea.hbm %s4468_s9, 8192 }
  0x4d   : > { %p3569_p12 = scmp.ne.s32.totalorder %s4468_s9, %s3568_s19  ;;  %p3575_p0 = scmp.lt.u32.totalorder %s3568_s19, %s4468_s9 }
  0x4f   : > { %p3571_p4 = pnand %p3569_p12, %p3933_p8 }
  0x51   : > { %p3572_p13 = pneg %p3571_p4 }
  0x53   : > { %p3577_p2 = pnand %p3575_p0, %p3572_p13 }
  0x55   : > { %3580 = shalt.err (!%p3577_p2)
}
  0x56   : > { %s3581_s17 = scalar_lea.vmem %s3923_s20, 8192  ;;  %p3589_p10 = scmp.lt.s32.totalorder %s3923_s20, %s3923_s20 }
  0x57   : > { %p3582_p5 = scmp.ne.s32.totalorder %s3923_s20, %s3581_s17  ;;  %p3590_p11 = scmp.lt.s32.totalorder %s3581_s17, %s3581_s17 }
  0x59   : > { %p3584_p7 = pnand %p3582_p5, %p3933_p8  ;;  %p3591_p12 = por %p3590_p11, %p3589_p10 }
  0x5b   : > { %p3585_p9 = pneg %p3584_p7 }
  0x5d   : > { %p3592_p4 = pnand %p3591_p12, %p3585_p9 }
  0x5f   : > { %3595 = shalt.err (!%p3592_p4)
}
  0x60   : > { %s3795_s10 = smov 512   ;;  %s3796_s1 = smov 32  }
  0x61   : > { %3350 = dma.hbm_to_vmem [thread:$0]  (!%p3919_p6), %s4468_s9, 8192, %s3923_s20, [#allocation13], %s3795_s10, %s3795_s10, %s3796_s1  }
  0x62   : > { %s3797_s23 = smov [#allocation8]   ;;  %s3798_s29 = smov [#allocation11]  }
  0x63   : > { %s365_s24 = sshll.u32 %s3797_s23, 4  ;;  %s391_s19 = sshll.u32 %s3798_s29, 4  ;;  %s366_s24 = int_to_ptr.vmem [resolvable:$true] %s365_s24  ;;  %s392_s19 = int_to_ptr.vmem [resolvable:$true] %s391_s19 }
  0x64   : > { %s3596_s30 = scalar_lea.hbm %s4461_s2, 16 }
  0x65   : > { %p3597_p13 = scmp.ne.s32.totalorder %s4461_s2, %s3596_s30  ;;  %p3603_p5 = scmp.lt.u32.totalorder %s3596_s30, %s4461_s2 }
  0x67   : > { %p3599_p0 = pnand %p3597_p13, %p3933_p8 }
  0x69   : > { %p3600_p2 = pneg %p3599_p0 }
  0x6b   : > { %p3605_p7 = pnand %p3603_p5, %p3600_p2 }
  0x6d   : > { %3608 = shalt.err (!%p3605_p7)
}
  0x6e   : > { %s3609_s20 = scalar_lea.vmem %s366_s24, 16  ;;  %s3616_s10 = scalar_lea.vmem %s366_s24, 32 }
  0x6f   : > { %p3610_p9 = scmp.ne.s32.totalorder %s366_s24, %s3609_s20  ;;  %p3617_p12 = scmp.lt.s32.totalorder %s366_s24, %s366_s24 }
  0x70   : > { %p3618_p4 = scmp.lt.s32.totalorder %s3616_s10, %s3609_s20 }
  0x71   : > { %p3612_p10 = pnand %p3610_p9, %p3933_p8 }
  0x72   : > { %p3619_p1 = por %p3618_p4, %p3617_p12 }
  0x73   : > { %p3613_p11 = pneg %p3612_p10 }
  0x75   : > { %p3620_p3 = pnand %p3619_p1, %p3613_p11 }
  0x77   : > { %3623 = shalt.err (!%p3620_p3)
}
  0x78   : > { %3341 = dma.hbm_to_vmem [thread:$0]  (!%p3919_p6), %s4461_s2, 16, %s366_s24, [#allocation7]  }
  0x79   : > { %s3624_s12 = scalar_lea.hbm %s4464_s5, 2048 }
  0x7a   : > { %p3625_p13 = scmp.ne.s32.totalorder %s4464_s5, %s3624_s12  ;;  %p3631_p3 = scmp.lt.u32.totalorder %s3624_s12, %s4464_s5 }
  0x7c   : > { %p3627_p0 = pnand %p3625_p13, %p3933_p8 }
  0x7e   : > { %p3628_p1 = pneg %p3627_p0 }
  0x80   : > { %p3633_p2 = pnand %p3631_p3, %p3628_p1 }
  0x82   : > { %3636 = shalt.err (!%p3633_p2)
}
  0x83   : > { %s3637_s22 = scalar_lea.vmem %s392_s19, 2048  ;;  %p3645_p10 = scmp.lt.s32.totalorder %s392_s19, %s392_s19 }
  0x84   : > { %p3638_p5 = scmp.ne.s32.totalorder %s392_s19, %s3637_s22  ;;  %p3646_p11 = scmp.lt.s32.totalorder %s3637_s22, %s3637_s22 }
  0x86   : > { %p3640_p7 = pnand %p3638_p5, %p3933_p8  ;;  %p3647_p12 = por %p3646_p11, %p3645_p10 }
  0x88   : > { %p3641_p9 = pneg %p3640_p7 }
  0x8a   : > { %p3648_p4 = pnand %p3647_p12, %p3641_p9 }
  0x8c   : > { %3651 = shalt.err (!%p3648_p4)
}
  0x8d   : > { %s3799_s24 = smov 128   ;;  %s3800_s30 = smov 8  }
  0x8e   : > { %3347 = dma.hbm_to_vmem [thread:$0]  (!%p3919_p6), %s4464_s5, 2048, %s392_s19, [#allocation10], %s3799_s24, %s3799_s24, %s3800_s30  }
  0x8f   : > { %s3801_s10 = smov [#allocation14]   ;;  %s3652_s8 = scalar_lea.hbm %s4470_s11, 8192 }
  0x90   : > { %s429_s3 = sshll.u32 %s3801_s10, 4  ;;  %p3653_p13 = scmp.ne.s32.totalorder %s4470_s11, %s3652_s8  ;;  %s430_s3 = int_to_ptr.vmem [resolvable:$true] %s429_s3 }
  0x91   : > { %p3659_p3 = scmp.lt.u32.totalorder %s3652_s8, %s4470_s11 }
  0x92   : > { %p3655_p0 = pnand %p3653_p13, %p3933_p8 }
  0x94   : > { %p3656_p1 = pneg %p3655_p0 }
  0x96   : > { %p3661_p2 = pnand %p3659_p3, %p3656_p1 }
  0x98   : > { %3664 = shalt.err (!%p3661_p2)
}
  0x99   : > { %s3665_s19 = scalar_lea.vmem %s430_s3, 8192  ;;  %p3673_p10 = scmp.lt.s32.totalorder %s430_s3, %s430_s3 }
  0x9a   : > { %p3666_p5 = scmp.ne.s32.totalorder %s430_s3, %s3665_s19  ;;  %p3674_p11 = scmp.lt.s32.totalorder %s3665_s19, %s3665_s19 }
  0x9c   : > { %p3668_p7 = pnand %p3666_p5, %p3933_p8  ;;  %p3675_p12 = por %p3674_p11, %p3673_p10 }
  0x9e   : > { %p3669_p9 = pneg %p3668_p7 }
  0xa0   : > { %p3676_p4 = pnand %p3675_p12, %p3669_p9 }
  0xa2   : > { %3679 = shalt.err (!%p3676_p4)
}
  0xa3   : > { %3353 = dma.hbm_to_vmem [thread:$0]  (!%p3919_p6), %s4470_s11, 8192, %s430_s3, [#allocation13], %s3799_s24, %s3799_s24, %s3800_s30  }
  0xa4   : > { %s2686_s18 = sadd.s32 4294967294, %s3788_s28   ;;  %s4063_s16 = sadd.s32 1, %s3788_s28  }
  0xa5   : > { %s36_s17 = ssub.s32 %s3788_s28, %s4063_s16  ;;  %s39_s20 = sadd.s32 1, %s3784_s27 }
  0xa6   : > { %p37_p8 = scmp.eq.s32.totalorder %s36_s17, 0  ;;  %p46_p13 = scmp.ne.s32.totalorder %s3784_s27, %s3780_s26 }
  0xa7   : > { %p47_p0 = scmp.eq.s32.totalorder %s3788_s28, 0  ;;  %p52_p1 = scmp.ne.s32.totalorder %s3780_s26, %s3776_s25 }
  0xa8   : > { %s4074_s10 = scalar_select %p37_p8, %s3784_s27, %s39_s20  }
  0xa9   : > { %p4076_p3 = por %p47_p0, %p46_p13  ;;  %p4490_p2 = scmp.eq.s32.totalorder %s3901_s14, 0 }
  0xaa   : > { %p328_p5 = scmp.eq.s32.totalorder %s3901_s14, 1  ;;  %p334_p7 = scmp.eq.s32.totalorder %s2686_s18, 1 }
  0xab   : > { %p4082_p6 = por %p4490_p2, %p52_p1  ;;  %p3368_p9 = scmp.lt.s32.totalorder %s3788_s28, 2 }
  0xac   : > { %s446_s7 = sand.u32 1, %s3784_s27   ;;  %p4089_p10 = por %p328_p5, %p46_p13 }
  0xad   : > { %p4093_p11 = por %p334_p7, %p52_p1  ;;  %s2695_s13 = sshll.u32 %s446_s7, 4 }
  0xae   : > { %s4492_s8 = scalar_select %p4089_p10, 1, 0 }
  0xaf   : > { %s4493_s12 = scalar_select %p4093_p11, 1, 0 }
  0xb0   : > { %s2750_s23 = sshll.u32 %s3788_s28, 8  ;;  %s450_s22 = scalar_lea.vmem [#allocation3], %s2695_s13 }
  0xb1   : > { %s4101_s21 = scalar_lea.hbm %s4459_s0, %s2750_s23  ;;  %s457_s18 = sshll.u32 %s450_s22, 4  ;;  %s4103_s18 = int_to_ptr.vmem [resolvable:$true] %s457_s18 }
  0xb2   : > { %p4107_p12 = pnand %p3368_p9, %p4076_p3  ;;  %s4111_s20 = scalar_lea.sflag [#allocation4], %s446_s7 }
  0xb3   : > { %s3680_s29 = scalar_lea.hbm %s4101_s21, 256  ;;  %s3685_s1 = scalar_lea.hbm %s4459_s0, 512 }
  0xb4   : > { %p3681_p4 = scmp.ne.s32.totalorder %s4101_s21, %s3680_s29  ;;  %p3682_p8 = pneg %p4107_p12 }
  0xb5   : > { %p3686_p1 = scmp.lt.u32.totalorder %s4101_s21, %s4459_s0  ;;  %p3687_p3 = scmp.lt.u32.totalorder %s3685_s1, %s3680_s29 }
  0xb6   : > { %p3683_p13 = pnand %p3682_p8, %p3681_p4  ;;  %p3689_p5 = scmp.lt.u32.totalorder %s3680_s29, %s4101_s21 }
  0xb7   : > { %p3688_p2 = por %p3687_p3, %p3686_p1 }
  0xb8   : > { %p3684_p0 = pneg %p3683_p13 }
  0xb9   : > { %p3690_p7 = por %p3689_p5, %p3688_p2 }
  0xbb   : > { %p3691_p9 = pnand %p3690_p7, %p3684_p0 }
  0xbd   : > { %3694 = shalt.err (!%p3691_p9)
}
  0xbe   : > { %s3695_s7 = scalar_lea.vmem %s4103_s18, 256  ;;  %s3802_s13 = smov [#allocation3]  }
  0xbf   : > { %p3696_p4 = scmp.ne.s32.totalorder %s4103_s18, %s3695_s7  ;;  %s3700_s23 = sshll.u32 %s3802_s13, 4  ;;  %s3701_s23 = int_to_ptr.vmem [resolvable:$false] %s3700_s23 }
  0xc0   : > { %s3702_s19 = scalar_lea.vmem %s3701_s23, 512  ;;  %p3703_p10 = scmp.lt.s32.totalorder %s4103_s18, %s3701_s23 }
  0xc1   : > { %p3698_p13 = pnand %p3696_p4, %p3682_p8  ;;  %p3704_p1 = scmp.lt.s32.totalorder %s3702_s19, %s3695_s7 }
  0xc3   : > { %p3699_p11 = pneg %p3698_p13  ;;  %p3705_p3 = por %p3704_p1, %p3703_p10 }
  0xc5   : > { %p3706_p2 = pnand %p3705_p3, %p3699_p11 }
  0xc7   : > { %3709 = shalt.err (!%p3706_p2)
}
  0xc8   : > { %3357 = dma.hbm_to_vmem [thread:$0]  (!%p4107_p12), %s4101_s21, 256, %s4103_s18, %s4111_s20, %s3799_s24, %s3799_s24, %s3800_s30  }
  0xc9   : > { %p4495_p8 = scmp.ne.s32.totalorder %s4484_s15, 0 }
  0xca   : > { %s4145_s29 = sand.u32 (!%p4495_p8), 1, %s3780_s26  }
  0xcb   : > { %469 = sbr.rel (%p4495_p8) target bundleno = 4133 (0x1025), region = 72  ;;  %s2699_s1 = sshll.u32 (!%p4495_p8), %s4145_s29, 4 }
  0xcc   : > { %s472_s22 = scalar_lea.sflag (!%p4495_p8), [#allocation4], %s4145_s29  ;;  %s475_s17 = scalar_lea.vmem (!%p4495_p8), [#allocation3], %s2699_s1 }
  0xd2   : > { %3755 = dma.done.wait (%p4082_p6), %s472_s22, 256  }
  0xd3   : > { %3757 = vsyncadd (%p4082_p6), %s472_s22, 4294967040  ;;  %p4496_p10 = scmp.eq.s32.totalorder %s3901_s14, 0 }
  0xd5   : > { %3759 = dma.done.wait (%p4496_p10), [#allocation7], 32   ;;  %p4497_p11 = pmov %p4496_p10 }
  0xd6   : > { %p4498_p12 = pmov %p4496_p10 }
  0xd7   : > { %3761 = vsyncadd (%p4497_p11), [#allocation7], 4294967264 }
  0xd8   : > { %3763 = dma.done.wait (%p4498_p12), [#allocation10], 8192   ;;  %p4499_p0 = pmov %p4496_p10 }
  0xda   : > { %3765 = vsyncadd (%p4499_p0), [#allocation10], 4294959104  ;;  %p4500_p5 = pmov %p4499_p0 }
  0xdb   : > { %p4501_p7 = pmov %p4499_p0 }
  0xdc   : > { %3767 = dma.done.wait (%p4500_p5), [#allocation13], 16384  }
  0xdd   : > { %3769 = vsyncadd (%p4501_p7), [#allocation13], 4294950912  ;;  %v4167_v0 = vld [vmem:[%s475_s17] sm:$0xff]  ;;  %v4170_v1 = vld [vmem:[%s475_s17 + $0x8] sm:$0xff]  ;;  %vm816_vm0 = vcmask 261120   ;;  %vm904_vm2 = vcmask 130048  }
  0xde   : > { %546 = vadd.xlane.f32.xlu0 %v4167_v0  ;;  %v586_v2 = vld [vmem:[#allocation9 + $0x8] sm:$0xff]  ;;  %v589_v3 = vld [vmem:[#allocation9 + $0x20] sm:$0xff]  ;;  %v588_v6 = vld [vmem:[#allocation9 + $0x18] sm:$0xff]  ;;  %s3804_s30 = smov 96   ;;  %s3805_s3 = smov 64  }
  0xdf   : > { %v585_v4 = vld [vmem:[#allocation9] sm:$0xff]  ;;  %v3037_v5 = vpack.c.bf16 %v589_v3, %v586_v2  ;;  %v592_v7 = vld [vmem:[#allocation9 + $0x38] sm:$0xff]  ;;  %v595_v8 = vld [vmem:[#allocation9 + $0x50] sm:$0xff]  ;;  %s3806_s21 = smov 32   ;;  %s4504_s23 = sld [smem:[#allocation23_spill]] }
  0xe0   : > { %v3039_v9 = vpack.c.bf16 %v588_v6, %v585_v4  ;;  %v3041_v10 = vpack.c.bf16 %v595_v8, %v592_v7  ;;  %v587_v11 = vld [vmem:[#allocation9 + $0x10] sm:$0xff]  ;;  %v590_v12 = vld [vmem:[#allocation9 + $0x28] sm:$0xff]  ;;  %v601_v17 = vld [vmem:[#allocation9 + $0x80] sm:$0xff]  ;;  %v3803_v6 = vmov 0.0   ;;  %s4505_s17 = sld [smem:[#allocation24_spill]]  ;;  %s4507_s18 = sld [smem:[#allocation26_spill]] }
  0xe1   : > { %v591_v13 = vld [vmem:[#allocation9 + $0x30] sm:$0xff]  ;;  %3038 = vmatprep.subr.bf16.mxu0 %v3037_v5  ;;  %v3069_v14 = vpack.c.bf16 %v590_v12, %v587_v11  ;;  %v594_v15 = vld [vmem:[#allocation9 + $0x48] sm:$0xff]  ;;  %v593_v19 = vld [vmem:[#allocation9 + $0x40] sm:$0xff]  ;;  %714 = vmatprep.mubr.f32.mxu0 %v3803_v6  ;;  %s541_s20 = scalar_lea.vmem [#allocation15], %s2699_s1  ;;  %s2751_s13 = sshll.u32 %s3901_s14, 8 }
  0xe2   : > { %548 = vadd.xlane.f32.xlu0 %v4170_v1  ;;  %v598_v16 = vld [vmem:[#allocation9 + $0x68] sm:$0xff]  ;;  %3040 = vmatpush1.bf16.msra.mxu0 %v3039_v9  ;;  %v3043_v18 = vpack.c.bf16 %v594_v15, %v591_v13  ;;  %v596_v20 = vld [vmem:[#allocation9 + $0x58] sm:$0xff]  ;;  %v597_v23 = vld [vmem:[#allocation9 + $0x60] sm:$0xff]  ;;  %s2556_s7 = sshll.u32 %s541_s20, 4  ;;  %s4508_s22 = sld [smem:[#allocation27_spill]]  ;;  %s4409_s7 = int_to_ptr.vmem [resolvable:$true] %s2556_s7 }
  0xe3   : > { %3042 = vmatprep.subr.bf16.mxu0 %v3041_v10  ;;  %3070 = vmatprep.subr.bf16.mxu1 %v3069_v14  ;;  %v3045_v21 = vpack.c.bf16 %v601_v17, %v598_v16  ;;  %v3073_v22 = vpack.c.bf16 %v596_v20, %v593_v19  ;;  %v600_v24 = vld [vmem:[#allocation9 + $0x78] sm:$0xff]  ;;  %v607_v35 = vld [vmem:[#allocation9 + $0xb0] sm:$0xff]  ;;  %v602_v38 = vld [vmem:[#allocation9 + $0x88] sm:$0xff]  ;;  %s2543_s1 = scalar_lea.sflag [#allocation5], %s4145_s29  ;;  %s3710_s15 = scalar_lea.vmem %s4409_s7, 256 }
  0xe4   : > { %3072 = vmatpush3.bf16.msra.mxu1 %v3069_v14  ;;  %v3047_v25 = vpack.c.bf16 %v600_v24, %v597_v23  ;;  %v604_v34 = vld [vmem:[#allocation9 + $0x98] sm:$0xff]  ;;  %v599_v36 = vld [vmem:[#allocation9 + $0x70] sm:$0xff]  ;;  %v606_v40 = vld [vmem:[#allocation9 + $0xa8] sm:$0xff]  ;;  %p3711_p6 = scmp.ne.s32.totalorder %s4409_s7, %s3710_s15  ;;  %p4509_p9 = scmp.ne.s32.totalorder %s4492_s8, 0 }
  0xe5   : > { %3074 = vmatprep.subr.bf16.mxu1 %v3073_v22  ;;  %v3049_v37 = vpack.c.bf16 %v607_v35, %v604_v34  ;;  %v603_v39 = vld [vmem:[#allocation9 + $0x90] sm:$0xff]  ;;  %v3077_v41 = vpack.c.bf16 %v602_v38, %v599_v36  ;;  %v610_v43 = vld [vmem:[#allocation9 + $0xc8] sm:$0xff]  ;;  %v613_v44 = vld [vmem:[#allocation9 + $0xe0] sm:$0xff]  ;;  %s3807_s14 = smov [#allocation15]  }
  0xe6   : > { %3044 = vmatpush1.bf16.msra.mxu0 %v3043_v18  ;;  %v3051_v42 = vpack.c.bf16 %v606_v40, %v603_v39  ;;  %v605_v45 = vld [vmem:[#allocation9 + $0xa0] sm:$0xff]  ;;  %v3053_v46 = vpack.c.bf16 %v613_v44, %v610_v43  ;;  %v608_v47 = vld [vmem:[#allocation9 + $0xb8] sm:$0xff]  ;;  %v619_v53 = vld [vmem:[#allocation9 + $0x110] sm:$0xff]  ;;  %v635_v39 = vlaneseq  ;;  %p3712_p4 = pnand %p3711_p6, %p4509_p9  ;;  %s3714_s24 = sshll.u32 %s3807_s14, 4  ;;  %s3715_s24 = int_to_ptr.vmem [resolvable:$false] %s3714_s24 }
  0xe7   : > { %3046 = vmatprep.subr.bf16.mxu0 %v3045_v21  ;;  %v609_v48 = vld [vmem:[#allocation9 + $0xc0] sm:$0xff]  ;;  %v612_v49 = vld [vmem:[#allocation9 + $0xd8] sm:$0xff]  ;;  %v3081_v50 = vpack.c.bf16 %v608_v47, %v605_v45  ;;  %v611_v54 = vld [vmem:[#allocation9 + $0xd0] sm:$0xff]  ;;  %p3717_p1 = scmp.lt.s32.totalorder %s4409_s7, %s3715_s24 }
  0xe8   : > { %3076 = vmatpush3.bf16.msra.mxu1 %v3073_v22  ;;  %v3055_v51 = vpack.c.bf16 %v612_v49, %v609_v48  ;;  %v616_v52 = vld [vmem:[#allocation9 + $0xf8] sm:$0xff]  ;;  %v614_v56 = vld [vmem:[#allocation9 + $0xe8] sm:$0xff]  ;;  %v615_v57 = vld [vmem:[#allocation9 + $0xf0] sm:$0xff]  ;;  %v4187_v40 = vshrl.u32 %v635_v39, 7  ;;  %p3713_p13 = pneg %p3712_p4 }
  0xe9   : > { %3078 = vmatprep.subr.bf16.mxu1 %v3077_v41  ;;  %v3057_v55 = vpack.c.bf16 %v619_v53, %v616_v52  ;;  %v618_v58 = vld [vmem:[#allocation9 + $0x108] sm:$0xff]  ;;  %v3085_v59 = vpack.c.bf16 %v614_v56, %v611_v54  ;;  %v625_v62 = vld [vmem:[#allocation9 + $0x140] sm:$0xff]  ;;  %v620_v3 = vld [vmem:[#allocation9 + $0x118] sm:$0xff] }
  0xea   : > { %3048 = vmatpush1.bf16.msra.mxu0 %v3047_v25  ;;  %v3059_v60 = vpack.c.bf16 %v618_v58, %v615_v57  ;;  %v622_v61 = vld [vmem:[#allocation9 + $0x128] sm:$0xff]  ;;  %v617_v63 = vld [vmem:[#allocation9 + $0x100] sm:$0xff]  ;;  %v624_v5 = vld [vmem:[#allocation9 + $0x138] sm:$0xff]  ;;  %v641_v43 = vsub.s32 1, %v4187_v40 }
  0xeb   : > { %3050 = vmatprep.subr.bf16.mxu0 %v3049_v37  ;;  %v3061_v2 = vpack.c.bf16 %v625_v62, %v622_v61  ;;  %v621_v4 = vld [vmem:[#allocation9 + $0x120] sm:$0xff]  ;;  %v3089_v7 = vpack.c.bf16 %v620_v3, %v617_v63  ;;  %v628_v9 = vld [vmem:[#allocation9 + $0x158] sm:$0xff]  ;;  %v631_v10 = vld [vmem:[#allocation9 + $0x170] sm:$0xff] }
  0xec   : > { %3080 = vmatpush3.bf16.msra.mxu1 %v3077_v41  ;;  %v3063_v8 = vpack.c.bf16 %v624_v5, %v621_v4  ;;  %v623_v11 = vld [vmem:[#allocation9 + $0x130] sm:$0xff]  ;;  %v3065_v12 = vpack.c.bf16 %v631_v10, %v628_v9  ;;  %v626_v13 = vld [vmem:[#allocation9 + $0x148] sm:$0xff]  ;;  %v629_v18 = vld [vmem:[#allocation9 + $0x160] sm:$0xff]  ;;  %v637_v41 = vsub.s32 0, %v4187_v40 }
  0xed   : > { %3082 = vmatprep.subr.bf16.mxu1 %v3081_v50  ;;  %v627_v14 = vld [vmem:[#allocation9 + $0x150] sm:$0xff]  ;;  %v630_v15 = vld [vmem:[#allocation9 + $0x168] sm:$0xff]  ;;  %v3093_v16 = vpack.c.bf16 %v626_v13, %v623_v11  ;;  %v632_v19 = vld [vmem:[#allocation9 + $0x178] sm:$0xff] }
  0xee   : > { %3052 = vmatpush1.bf16.msra.mxu0 %v3051_v42  ;;  %v3067_v17 = vpack.c.bf16 %v630_v15, %v627_v14  ;;  %v3097_v20 = vpack.c.bf16 %v632_v19, %v629_v18  ;;  %v645_v42 = vsub.s32 2, %v4187_v40  ;;  %vm4207_vm1 = vmpackc.low %vm816_vm0, %vm816_vm0 }
  0xef   : > { %3054 = vmatprep.subr.bf16.mxu0 %v3053_v46 }
  0xf0   : > { %3084 = vmatpush3.bf16.msra.mxu1 %v3081_v50 }
  0xf1   : > { %3086 = vmatprep.subr.bf16.mxu1 %v3085_v59 }
  0xf2   : > { %3056 = vmatpush1.bf16.msra.mxu0 %v3055_v51 }
  0xf3   : > { %3058 = vmatprep.subr.bf16.mxu0 %v3057_v55 }
  0xf4   : > { %3088 = vmatpush3.bf16.msra.mxu1 %v3085_v59 }
  0xf5   : > { %3090 = vmatprep.subr.bf16.mxu1 %v3089_v7 }
  0xf6   : > { %3060 = vmatpush1.bf16.msra.mxu0 %v3059_v60 }
  0xf7   : > { %3062 = vmatprep.subr.bf16.mxu0 %v3061_v2 }
  0xf8   : > { %3092 = vmatpush3.bf16.msra.mxu1 %v3089_v7 }
  0xf9   : > { %3094 = vmatprep.subr.bf16.mxu1 %v3093_v16 }
  0xfa   : > { %3064 = vmatpush1.bf16.msra.mxu0 %v3063_v8 }
  0xfb   : > { %3066 = vmatprep.subr.bf16.mxu0 %v3065_v12 }
  0xfc   : > { %3096 = vmatpush3.bf16.msra.mxu1 %v3093_v16 }
  0xfd   : > { %3098 = vmatprep.subr.bf16.mxu1 %v3097_v20 }
  0xfe   : > { %3068 = vmatpush1.bf16.msra.mxu0 %v3067_v17 }
 0x100   : > { %3100 = vmatpush3.bf16.msra.mxu1 %v3097_v20 }
 0x16b   : > { %v547_v26 = vpop.xlane.xlu0 %546 }
 0x16c   : > { %v551_v27 = vmul.f32 0.0078125, %v547_v26 }
 0x16e   : > { %v4174_v28 = vsub.f32 %v4167_v0, %v551_v27 }
 0x16f   : > { %v549_v29 = vpop.xlane.xlu0 %548 }
 0x170   : > { %v552_v30 = vmul.f32 0.0078125, %v549_v29  ;;  %v555_v31 = vmul.f32 %v4174_v28, %v4174_v28  ;;  %v2707_v29 = vld [vmem:[#allocation6] ss:$0 sm:$0xff] }
 0x172   : > { %v4179_v32 = vsub.f32 %v4170_v1, %v552_v30  ;;  %557 = vadd.xlane.f32.xlu1 %v555_v31  ;;  %v2708_v31 = vld [vmem:[#allocation8] ss:$0 sm:$0xff] }
 0x174   : > { %v556_v33 = vmul.f32 %v4179_v32, %v4179_v32 }
 0x176   : > { %559 = vadd.xlane.f32.xlu1 %v556_v33 }
 0x1ff   : > { %v558_v21 = vpop.xlane.xlu1 %557 }
 0x200   : > { %v561_v22 = vmul.f32 0.0078125, %v558_v21 }
 0x202   : > { %v563_v23 = vadd.f32 1e-05, %v561_v22 }
 0x203   : > { %v560_v24 = vpop.xlane.xlu1 %559 }
 0x204   : > { %3456 = vrsqrt.f32 %v563_v23  ;;  %v562_v25 = vmul.f32 0.0078125, %v560_v24 }
 0x206   : > { %v564_v26 = vadd.f32 1e-05, %v562_v25 }
 0x208   : > { %3458 = vrsqrt.f32 %v564_v26 }
 0x20e   : > { %v3457_v27 = vpop.eup %3456 }
 0x20f   : > { %v567_v30 = vmul.f32 %v3457_v27, %v4174_v28  ;;  %v633_v28 = vld [vmem:[%s4463_s4] sm:$0x7] }
 0x210   : > { %v646_v47 = vrot.slane %v633_v28, %v645_v42  ;;  %v642_v48 = vrot.slane %v633_v28, %v641_v43 }
 0x211   : > { %v575_v33 = vmul.f32 %v2707_v29, %v567_v30 }
 0x212   : > { %v3459_v34 = vpop.eup %3458 }
 0x213   : > { %v583_v35 = vadd.f32 %v2708_v31, %v575_v33  ;;  %v568_v36 = vmul.f32 %v3459_v34, %v4179_v32  ;;  %v638_v32 = vrot.slane %v633_v28, %v637_v41 }
 0x215   : > { %715 = vmatmul.mubr.f32.vlgmr.msra.gmra.mrb[0].mxu0 %v583_v35  ;;  %2934 = vmatprep.mubr.f32.mxu1 %v583_v35  ;;  %v576_v37 = vmul.f32 %v2707_v29, %v568_v36 }
 0x216   : > { %720 = vmatprep.mubr.f32.mxu0 %v3803_v6 }
 0x217   : > { %v584_v38 = vadd.f32 %v2708_v31, %v576_v37 }
 0x219   : > { %721 = vmatmul.mubr.f32.gmra.mrb[2].mxu0 %v584_v38  ;;  %2935 = vmatmul.mubr.f32.vlgmr.msra.gmra.mrb[0].mxu1 %v584_v38 }
 0x2e8   : > { %v716_v44 = vpop.f32.mrb[0].mxu0 }
 0x2e9   : > { %v717_v45 = vadd.f32 %v716_v44, %v638_v32  ;;  %v718_v46 = vpop.f32.mrb[1].mxu0 }
 0x2ea   : > { %v719_v55 = vadd.f32 %v718_v46, %v642_v48 }
 0x2eb   : > { %v4201_v49 = vmul.f32 0.17677669, %v717_v45 }
 0x2ec   : > { %v722_v50 = vpop.f32.mrb[2].mxu0  ;;  %v2936_v51 = vpop.f32.mrb[0].mxu1 }
 0x2ed   : > { %v799_v52 = vadd.f32 %v2936_v51, %v646_v47  ;;  %v724_v53 = vpop.f32.mrb[3].mxu0  ;;  %v793_v54 = vpop.f32.mrb[1].mxu1  ;;  %2941 = vmatprep.mubr.msk.f32.mxu0 %vm816_vm0, %v4201_v49  ;;  %v723_v63 = vadd.f32 %v722_v50, %v638_v32 }
 0x2ee   : > { %v725_v56 = vadd.f32 %v724_v53, %v642_v48  ;;  %v794_v57 = vadd.f32 %v793_v54, %v646_v47 }
 0x2ef   : > { %v4219_v2 = vmul.f32 0.17677669, %v723_v63 }
 0x2f0   : > { %v3101_v59 = vpack.c.bf16 %v725_v56, %v719_v55  ;;  %v3107_v60 = vpack.c.bf16 %v799_v52, %v794_v57  ;;  %v4211_v61 = vpack.i.bf16 %v725_v56, %v719_v55  ;;  %v4213_v62 = vpack.i.bf16 %v799_v52, %v794_v57  ;;  %v1214_v55 = vld [vmem:[#allocation11 + $0x20] sm:$0xff]  ;;  %v1215_v56 = vld [vmem:[#allocation11 + $0x28] sm:$0xff]  ;;  %v1216_v57 = vld [vmem:[#allocation11 + $0x30] sm:$0xff] }
 0x2f2   : > { %3103 = vmatprep.subr.msk.bf16.mxu0 %vm4207_vm1, %v3101_v59  ;;  %3108 = vmatprep.subr.bf16.mxu1 %v3107_v60 }
 0x2f3   : > { %3106 = vmatpush3.bf16.xpose.msk.msra.mxu0 %vm4207_vm1, %v3101_v59  ;;  %3110 = vmatpush3.bf16.msra.mxu1 %v3107_v60  ;;  %v3121_v59 = vpack.c.bf16 %v1215_v56, %v1214_v55  ;;  %v1217_v60 = vld [vmem:[#allocation11 + $0x38] sm:$0xff] }
 0x2f4   : > { %v3125_v63 = vpack.c.bf16 %v1217_v60, %v1216_v57 }
 0x2f5   : > { %3122 = vmatprep.subr.bf16.mxu0 %v3121_v59 }
 0x2fa   : > { %2942 = vmatmul.mubr.msk.f32.vlgmr.msra.gmra.mrb[4].mxu0 %vm816_vm0, %v4219_v2 }
 0x2fb   : > { %3124 = vmatpush3.bf16.msra.mxu0 %v3121_v59 }
 0x2fc   : > { %3126 = vmatprep.subr.bf16.mxu0 %v3125_v63 }
 0x2ff   : > { %3128 = vmatpush3.bf16.msra.mxu0 %v3125_v63 }
 0x3cd   : > { %v2943_v3 = vpop.f32.mrb[4].mxu0 }
 0x3ce   : > { %v895_v4 = vpop.f32.mrb[5].mxu0  ;;  %v908_v5 = vsel %vm904_vm2, %v2943_v3, -inf }
 0x3cf   : > { %909 = vmax.xlane.f32.xlu1 %v908_v5  ;;  %v905_v7 = vsel %vm904_vm2, %v895_v4, -inf }
 0x3d0   : > { %906 = vmax.xlane.f32.xlu0 %v905_v7 }
 0x45c   : > { %v910_v8 = vpop.xlane.xlu1 %909 }
 0x45d   : > { %v912_v9 = vsub.f32 %v2943_v3, %v910_v8  ;;  %v907_v10 = vpop.xlane.xlu0 %906 }
 0x45e   : > { %v911_v11 = vsub.f32 %v895_v4, %v907_v10 }
 0x45f   : > { %v915_v12 = vmul.f32 1.442695, %v912_v9 }
 0x460   : > { %v913_v13 = vmul.f32 1.442695, %v911_v11 }
 0x461   : > { %3460 = vpow2.f32 %v915_v12 }
 0x462   : > { %3462 = vpow2.f32 %v913_v13 }
 0x46b   : > { %v3461_v14 = vpop.eup %3460 }
 0x46c   : > { %v3463_v15 = vpop.eup %3462  ;;  %v920_v16 = vsel %vm904_vm2, %v3461_v14, 0.0 }
 0x46d   : > { %921 = vadd.xlane.f32.xlu1 %v920_v16  ;;  %v917_v17 = vsel %vm904_vm2, %v3463_v15, 0.0  ;;  %v1008_v16 = vld [vmem:[#allocation11] sm:$0xff] }
 0x46e   : > { %918 = vadd.xlane.f32.xlu0 %v917_v17  ;;  %v1009_v17 = vld [vmem:[#allocation11 + $0x8] sm:$0xff] }
 0x47e   : > { %1012 = vrot.lane.b32.xlu1 %v4201_v49, %s3804_s30 }
 0x482   : > { %1014 = vrot.lane.b32.xlu1 %v4219_v2, %s3804_s30 }
 0x484   : > { %3427 = vrot.lane.b32.xlu0 %v4211_v61, %s3804_s30 }
 0x4fa   : > { %v922_v18 = vpop.xlane.xlu1 %921 }
 0x4fb   : > { %3464 = vrcp.f32 %v922_v18  ;;  %v919_v19 = vpop.xlane.xlu0 %918  ;;  %v3129_v18 = vpack.c.bf16 %v1009_v17, %v1008_v16 }
 0x4fc   : > { %3466 = vrcp.f32 %v919_v19  ;;  %v1010_v19 = vld [vmem:[#allocation11 + $0x10] sm:$0xff] }
 0x4fd   : > { %3130 = vmatprep.subr.bf16.mxu0 %v3129_v18 }
 0x4fe   : > { %v1013_v29 = vpop.permute.xlu1 %1012 }
 0x4ff   : > { %v3428_v20 = vpop.permute.xlu0 %3427 }
 0x500   : > { %v3430_v21 = vunpack.i.h.bf16 %v3428_v20  ;;  %v3429_v22 = vunpack.i.l.bf16 %v3428_v20  ;;  %v1011_v20 = vld [vmem:[#allocation11 + $0x18] sm:$0xff] }
 0x502   : > { %v3111_v23 = vpack.c.bf16 %v3430_v21, %v3429_v22  ;;  %v1015_v30 = vpop.permute.xlu1 %1014 }
 0x504   : > { %3113 = vmatprep.subr.msk.bf16.mxu1 %vm4207_vm1, %v3111_v23 }
 0x505   : > { %v3465_v24 = vpop.eup %3464 }
 0x506   : > { %v3467_v25 = vpop.eup %3466  ;;  %v926_v27 = vmul.f32 %v3465_v24, %v3461_v14 }
 0x507   : > { %v925_v26 = vmul.f32 %v3467_v25, %v3463_v15 }
 0x509   : > { %2948 = vmatprep.mubr.msk.f32.mxu1 %vm904_vm2, %v925_v26 }
 0x50a   : > { %2949 = vmatmul.mubr.msk.f32.vlgmr.msra.gmra.mrb[2].mxu1 %vm904_vm2, %v926_v27 }
 0x50b   : > { %3116 = vmatpush3.bf16.xpose.msk.msra.mxu1 %vm4207_vm1, %v3111_v23  ;;  %2955 = vmatprep.mubr.msk.f32.mxu1 %vm816_vm0, %v1013_v29  ;;  %v3133_v23 = vpack.c.bf16 %v1011_v20, %v1010_v19 }
 0x512   : > { %2956 = vmatmul.mubr.msk.f32.vlgmr.msra.gmra.mrb[4].mxu1 %vm816_vm0, %v1015_v30 }
 0x5dd   : > { %v4241_v31 = vpop.f32.mrb[2].mxu1 }
 0x5de   : > { %v4243_v33 = vpop.f32.mrb[3].mxu1 }
 0x5e5   : > { %v2957_v34 = vpop.f32.mrb[4].mxu1 }
 0x5e6   : > { %v1094_v35 = vpop.f32.mrb[5].mxu1  ;;  %v1106_v36 = vsel %vm904_vm2, %v2957_v34, -inf }
 0x5e7   : > { %1107 = vmax.xlane.f32.xlu0 %v1106_v36  ;;  %v1103_v37 = vsel %vm904_vm2, %v1094_v35, -inf }
 0x5e8   : > { %1104 = vmax.xlane.f32.xlu1 %v1103_v37 }
 0x5f9   : > { %3432 = vrot.lane.b32.xlu1 %v4213_v62, %s3804_s30  ;;  %s4506_s30 = sld [smem:[#allocation25_spill]] }
 0x5fd   : > { %1380 = vrot.lane.b32.xlu1 %v4201_v49, %s3805_s3 }
 0x601   : > { %1382 = vrot.lane.b32.xlu1 %v4219_v2, %s3805_s3 }
 0x674   : > { %v1108_v38 = vpop.xlane.xlu0 %1107 }
 0x675   : > { %v1110_v39 = vsub.f32 %v2957_v34, %v1108_v38  ;;  %v1105_v28 = vpop.xlane.xlu1 %1104 }
 0x676   : > { %v1109_v32 = vsub.f32 %v1094_v35, %v1105_v28 }
 0x677   : > { %v1113_v44 = vmul.f32 1.442695, %v1110_v39 }
 0x678   : > { %v1111_v45 = vmul.f32 1.442695, %v1109_v32 }
 0x679   : > { %3468 = vpow2.f32 %v1113_v44  ;;  %v3433_v46 = vpop.permute.xlu1 %3432  ;;  %v1580_v44 = vld [vmem:[#allocation11 + $0x40] sm:$0xff] }
 0x67a   : > { %v3435_v47 = vunpack.i.h.bf16 %v3433_v46  ;;  %v3434_v48 = vunpack.i.l.bf16 %v3433_v46  ;;  %3470 = vpow2.f32 %v1111_v45  ;;  %v1581_v45 = vld [vmem:[#allocation11 + $0x48] sm:$0xff]  ;;  %v1582_v46 = vld [vmem:[#allocation11 + $0x50] sm:$0xff] }
 0x67c   : > { %v3117_v50 = vpack.c.bf16 %v3435_v47, %v3434_v48  ;;  %v3147_v47 = vpack.c.bf16 %v1581_v45, %v1580_v44  ;;  %v1583_v48 = vld [vmem:[#allocation11 + $0x58] sm:$0xff] }
 0x67d   : > { %v1381_v14 = vpop.permute.xlu1 %1380 }
 0x67e   : > { %3118 = vmatprep.subr.bf16.mxu1 %v3117_v50 }
 0x67f   : > { %3120 = vmatpush3.bf16.msra.mxu1 %v3117_v50  ;;  %v3151_v50 = vpack.c.bf16 %v1583_v48, %v1582_v46  ;;  %v2006_v46 = vld [vmem:[#allocation12 + $0x8] sm:$0xff]  ;;  %v2008_v48 = vld [vmem:[#allocation12 + $0x18] sm:$0xff] }
 0x681   : > { %v1383_v15 = vpop.permute.xlu1 %1382 }
 0x683   : > { %v3469_v51 = vpop.eup %3468 }
 0x684   : > { %v1118_v52 = vsel %vm904_vm2, %v3469_v51, 0.0  ;;  %v3471_v53 = vpop.eup %3470 }
 0x685   : > { %1119 = vadd.xlane.f32.xlu0 %v1118_v52  ;;  %v1115_v54 = vsel %vm904_vm2, %v3471_v53, 0.0 }
 0x689   : > { %1116 = vadd.xlane.f32.xlu0 %v1115_v54 }
 0x69f   : > { %3437 = vrot.lane.b32.xlu0 %v4211_v61, %s3805_s3 }
 0x712   : > { %v1120_v3 = vpop.xlane.xlu0 %1119 }
 0x713   : > { %3472 = vrcp.f32 %v1120_v3 }
 0x716   : > { %v1117_v4 = vpop.xlane.xlu0 %1116 }
 0x717   : > { %3474 = vrcp.f32 %v1117_v4 }
 0x71a   : > { %v3438_v5 = vpop.permute.xlu0 %3437 }
 0x71b   : > { %v3440_v7 = vunpack.i.h.bf16 %v3438_v5  ;;  %v3439_v8 = vunpack.i.l.bf16 %v3438_v5 }
 0x71d   : > { %v3137_v9 = vpack.c.bf16 %v3440_v7, %v3439_v8  ;;  %v3473_v10 = vpop.eup %3472 }
 0x71e   : > { %v1124_v13 = vmul.f32 %v3473_v10, %v3469_v51 }
 0x71f   : > { %3139 = vmatprep.subr.msk.bf16.mxu1 %vm4207_vm1, %v3137_v9 }
 0x721   : > { %v3475_v11 = vpop.eup %3474 }
 0x722   : > { %v1123_v12 = vmul.f32 %v3475_v11, %v3471_v53 }
 0x724   : > { %2962 = vmatprep.mubr.msk.f32.mxu1 %vm904_vm2, %v1123_v12 }
 0x725   : > { %2963 = vmatmul.mubr.msk.f32.vlgmr.msra.gmra.mrb[6].mxu1 %vm904_vm2, %v1124_v13 }
 0x726   : > { %3142 = vmatpush3.bf16.xpose.msk.msra.mxu1 %vm4207_vm1, %v3137_v9  ;;  %2991 = vmatprep.mubr.msk.f32.mxu1 %vm816_vm0, %v1381_v14 }
 0x72d   : > { %2992 = vmatmul.mubr.msk.f32.vlgmr.msra.gmra.mrb[8].mxu1 %vm816_vm0, %v1383_v15 }
 0x7f8   : > { %v2964_v21 = vpop.f32.mrb[6].mxu1 }
 0x7f9   : > { %v1205_v22 = vpop.f32.mrb[7].mxu1 }
 0x7fa   : > { %2973 = vmatprep.mubr.msk.f32.mxu0 %vm816_vm0, %v1205_v22 }
 0x7fb   : > { %2974 = vmatmul.mubr.msk.f32.vlgmr.msra.gmra.mrb[6].mxu0 %vm816_vm0, %v2964_v21 }
 0x7fc   : > { %3132 = vmatpush3.bf16.msra.mxu0 %v3129_v18  ;;  %2984 = vmatprep.mubr.msk.f32.mxu0 %vm816_vm0, %v4243_v33 }
 0x7fd   : > { %3134 = vmatprep.subr.bf16.mxu0 %v3133_v23 }
 0x800   : > { %v2993_v24 = vpop.f32.mrb[8].mxu1  ;;  %3136 = vmatpush3.bf16.msra.mxu0 %v3133_v23  ;;  %v1867_v23 = vld [vmem:[#allocation11 + $0x60] sm:$0xff] }
 0x801   : > { %v1462_v25 = vpop.f32.mrb[9].mxu1  ;;  %v1474_v26 = vsel %vm904_vm2, %v2993_v24, -inf  ;;  %3148 = vmatprep.subr.bf16.mxu0 %v3147_v47 }
 0x802   : > { %1475 = vmax.xlane.f32.xlu0 %v1474_v26  ;;  %v1471_v27 = vsel %vm904_vm2, %v1462_v25, -inf }
 0x803   : > { %1472 = vmax.xlane.f32.xlu1 %v1471_v27  ;;  %2985 = vmatmul.mubr.msk.f32.vlgmr.msra.gmra.mrb[6].mxu0 %vm816_vm0, %v4241_v31  ;;  %v1870_v27 = vld [vmem:[#allocation11 + $0x78] sm:$0xff] }
 0x804   : > { %3150 = vmatpush3.bf16.msra.mxu0 %v3147_v47  ;;  %v2010_v47 = vld [vmem:[#allocation12 + $0x28] sm:$0xff] }
 0x805   : > { %3152 = vmatprep.subr.bf16.mxu0 %v3151_v50 }
 0x808   : > { %3154 = vmatpush3.bf16.msra.mxu0 %v3151_v50  ;;  %v3173_v50 = vpack.c.bf16 %v2010_v47, %v2006_v46  ;;  %v2042_v46 = vld [vmem:[#allocation12 + $0x128] sm:$0xff]  ;;  %v2040_v47 = vld [vmem:[#allocation12 + $0x118] sm:$0xff] }
 0x814   : > { %3442 = vrot.lane.b32.xlu1 %v4213_v62, %s3805_s3 }
 0x818   : > { %1667 = vrot.lane.b32.xlu1 %v4201_v49, %s3806_s21 }
 0x81c   : > { %1669 = vrot.lane.b32.xlu1 %v4219_v2, %s3806_s21 }
 0x88f   : > { %v1476_v29 = vpop.xlane.xlu0 %1475 }
 0x890   : > { %v1478_v30 = vsub.f32 %v2993_v24, %v1476_v29  ;;  %v1473_v33 = vpop.xlane.xlu1 %1472  ;;  %v1868_v24 = vld [vmem:[#allocation11 + $0x68] sm:$0xff] }
 0x891   : > { %v1477_v34 = vsub.f32 %v1462_v25, %v1473_v33  ;;  %v1869_v25 = vld [vmem:[#allocation11 + $0x70] sm:$0xff]  ;;  %v3165_v26 = vpack.c.bf16 %v1868_v24, %v1867_v23 }
 0x892   : > { %v1481_v35 = vmul.f32 1.442695, %v1478_v30  ;;  %v3169_v29 = vpack.c.bf16 %v1870_v27, %v1869_v25 }
 0x893   : > { %v1479_v36 = vmul.f32 1.442695, %v1477_v34  ;;  %3166 = vmatprep.subr.bf16.mxu0 %v3165_v26 }
 0x894   : > { %3476 = vpow2.f32 %v1481_v35  ;;  %v3443_v37 = vpop.permute.xlu1 %3442 }
 0x895   : > { %v3445_v38 = vunpack.i.h.bf16 %v3443_v37  ;;  %v3444_v31 = vunpack.i.l.bf16 %v3443_v37  ;;  %3478 = vpow2.f32 %v1479_v36 }
 0x897   : > { %v3143_v39 = vpack.c.bf16 %v3445_v38, %v3444_v31 }
 0x898   : > { %v1668_v63 = vpop.permute.xlu1 %1667 }
 0x899   : > { %3144 = vmatprep.subr.bf16.mxu1 %v3143_v39 }
 0x89a   : > { %3146 = vmatpush3.bf16.msra.mxu1 %v3143_v39  ;;  %v2741_v39 = vld [vmem:[%s4465_s6] ss:$0 sm:$0xff] }
 0x89c   : > { %v1670_v3 = vpop.permute.xlu1 %1669 }
 0x89e   : > { %v3477_v28 = vpop.eup %3476 }
 0x89f   : > { %v1486_v49 = vsel %vm904_vm2, %v3477_v28, 0.0  ;;  %v3479_v32 = vpop.eup %3478 }
 0x8a0   : > { %1487 = vadd.xlane.f32.xlu0 %v1486_v49  ;;  %v1483_v2 = vsel %vm904_vm2, %v3479_v32, 0.0 }
 0x8a4   : > { %1484 = vadd.xlane.f32.xlu0 %v1483_v2 }
 0x8ba   : > { %3447 = vrot.lane.b32.xlu0 %v4211_v61, %s3806_s21 }
 0x92d   : > { %v1488_v51 = vpop.xlane.xlu0 %1487 }
 0x92e   : > { %3480 = vrcp.f32 %v1488_v51  ;;  %v2012_v51 = vld [vmem:[#allocation12 + $0x38] sm:$0xff] }
 0x931   : > { %v1485_v52 = vpop.xlane.xlu0 %1484 }
 0x932   : > { %3482 = vrcp.f32 %v1485_v52  ;;  %v2005_v52 = vld [vmem:[#allocation12] sm:$0xff] }
 0x935   : > { %v3448_v53 = vpop.permute.xlu0 %3447 }
 0x936   : > { %v3450_v54 = vunpack.i.h.bf16 %v3448_v53  ;;  %v3449_v55 = vunpack.i.l.bf16 %v3448_v53  ;;  %v2009_v53 = vld [vmem:[#allocation12 + $0x20] sm:$0xff] }
 0x938   : > { %v3155_v56 = vpack.c.bf16 %v3450_v54, %v3449_v55  ;;  %v3481_v61 = vpop.eup %3480  ;;  %v3205_v54 = vpack.c.bf16 %v2012_v51, %v2008_v48  ;;  %v3175_v55 = vpack.c.bf16 %v2009_v53, %v2005_v52  ;;  %v2037_v51 = vld [vmem:[#allocation12 + $0x100] sm:$0xff] }
 0x939   : > { %v1492_v60 = vmul.f32 %v3481_v61, %v3477_v28  ;;  %v2011_v61 = vld [vmem:[#allocation12 + $0x30] sm:$0xff]  ;;  %v2041_v52 = vld [vmem:[#allocation12 + $0x120] sm:$0xff] }
 0x93a   : > { %3157 = vmatprep.subr.msk.bf16.mxu1 %vm4207_vm1, %v3155_v56 }
 0x93c   : > { %v3483_v57 = vpop.eup %3482 }
 0x93d   : > { %v1491_v59 = vmul.f32 %v3483_v57, %v3479_v32 }
 0x93f   : > { %2998 = vmatprep.mubr.msk.f32.mxu1 %vm904_vm2, %v1491_v59  ;;  %v2018_v59 = vld [vmem:[#allocation12 + $0x68] sm:$0xff] }
 0x940   : > { %2999 = vmatmul.mubr.msk.f32.vlgmr.msra.gmra.mrb[10].mxu1 %vm904_vm2, %v1492_v60  ;;  %v2016_v60 = vld [vmem:[#allocation12 + $0x58] sm:$0xff] }
 0x941   : > { %3160 = vmatpush3.bf16.xpose.msk.msra.mxu1 %vm4207_vm1, %v3155_v56  ;;  %3016 = vmatprep.mubr.msk.f32.mxu1 %vm816_vm0, %v1668_v63  ;;  %v2007_v56 = vld [vmem:[#allocation12 + $0x10] sm:$0xff] }
 0x942   : > { %v3207_v57 = vpack.c.bf16 %v2011_v61, %v2007_v56  ;;  %v2043_v56 = vld [vmem:[#allocation12 + $0x130] sm:$0xff] }
 0x948   : > { %3017 = vmatmul.mubr.msk.f32.vlgmr.msra.gmra.mrb[12].mxu1 %vm816_vm0, %v1670_v3 }
 0xa13   : > { %v3000_v4 = vpop.f32.mrb[10].mxu1 }
 0xa14   : > { %v1571_v5 = vpop.f32.mrb[11].mxu1 }
 0xa15   : > { %3009 = vmatprep.mubr.msk.f32.mxu0 %vm816_vm0, %v1571_v5  ;;  %v2017_v5 = vld [vmem:[#allocation12 + $0x60] sm:$0xff] }
 0xa16   : > { %3010 = vmatmul.mubr.msk.f32.vlgmr.msra.gmra.mrb[6].mxu0 %vm816_vm0, %v3000_v4  ;;  %v2013_v4 = vld [vmem:[#allocation12 + $0x40] sm:$0xff] }
 0xa17   : > { %3168 = vmatpush3.bf16.msra.mxu0 %v3165_v26 }
 0xa18   : > { %3170 = vmatprep.subr.bf16.mxu0 %v3169_v29 }
 0xa1b   : > { %v3018_v7 = vpop.f32.mrb[12].mxu1  ;;  %3172 = vmatpush3.bf16.msra.mxu0 %v3169_v29 }
 0xa1c   : > { %v1749_v8 = vpop.f32.mrb[13].mxu1  ;;  %v1761_v9 = vsel %vm904_vm2, %v3018_v7, -inf  ;;  %3206 = vmatprep.subr.bf16.mxu0 %v3205_v54  ;;  %v3191_v54 = vpack.c.bf16 %v2041_v52, %v2037_v51 }
 0xa1d   : > { %1762 = vmax.xlane.f32.xlu0 %v1761_v9  ;;  %v1758_v10 = vsel %vm904_vm2, %v1749_v8, -inf  ;;  %v2019_v9 = vld [vmem:[#allocation12 + $0x70] sm:$0xff] }
 0xa1e   : > { %1759 = vmax.xlane.f32.xlu1 %v1758_v10  ;;  %v2022_v10 = vld [vmem:[#allocation12 + $0x88] sm:$0xff] }
 0xa2f   : > { %3452 = vrot.lane.b32.xlu1 %v4213_v62, %s3806_s21 }
 0xaaa   : > { %v1763_v58 = vpop.xlane.xlu0 %1762 }
 0xaab   : > { %v1765_v11 = vsub.f32 %v3018_v7, %v1763_v58  ;;  %v1760_v12 = vpop.xlane.xlu1 %1759  ;;  %v2015_v7 = vld [vmem:[#allocation12 + $0x50] sm:$0xff]  ;;  %v2026_v58 = vld [vmem:[#allocation12 + $0xa8] sm:$0xff] }
 0xaac   : > { %v1764_v13 = vsub.f32 %v1749_v8, %v1760_v12  ;;  %v3179_v8 = vpack.c.bf16 %v2017_v5, %v2013_v4  ;;  %v3181_v12 = vpack.c.bf16 %v2026_v58, %v2022_v10  ;;  %v2058_v58 = vld [vmem:[#allocation12 + $0x1a8] sm:$0xff] }
 0xaad   : > { %v1768_v14 = vmul.f32 1.442695, %v1765_v11  ;;  %v3211_v11 = vpack.c.bf16 %v2019_v9, %v2015_v7  ;;  %v2047_v7 = vld [vmem:[#allocation12 + $0x150] sm:$0xff]  ;;  %v2054_v9 = vld [vmem:[#allocation12 + $0x188] sm:$0xff] }
 0xaae   : > { %v1766_v15 = vmul.f32 1.442695, %v1764_v13  ;;  %v2024_v13 = vld [vmem:[#allocation12 + $0x98] sm:$0xff] }
 0xaaf   : > { %v3453_v16 = vpop.permute.xlu1 %3452 }
 0xab0   : > { %3484 = vpow2.f32 %v1766_v15  ;;  %v3455_v17 = vunpack.i.h.bf16 %v3453_v16  ;;  %v3454_v18 = vunpack.i.l.bf16 %v3453_v16  ;;  %v2021_v15 = vld [vmem:[#allocation12 + $0x80] sm:$0xff] }
 0xab1   : > { %3486 = vpow2.f32 %v1768_v14  ;;  %v2028_v14 = vld [vmem:[#allocation12 + $0xb8] sm:$0xff] }
 0xab2   : > { %v3161_v19 = vpack.c.bf16 %v3455_v17, %v3454_v18  ;;  %v3213_v16 = vpack.c.bf16 %v2028_v14, %v2024_v13  ;;  %v2025_v17 = vld [vmem:[#allocation12 + $0xa0] sm:$0xff]  ;;  %v2023_v18 = vld [vmem:[#allocation12 + $0x90] sm:$0xff]  ;;  %v3197_v13 = vpack.c.bf16 %v2058_v58, %v2054_v9 }
 0xab3   : > { %v2319_v9 = vld [vmem:[#allocation14 + $0x10] sm:$0xff] }
 0xab4   : > { %3162 = vmatprep.subr.bf16.mxu1 %v3161_v19 }
 0xab5   : > { %3164 = vmatpush3.bf16.msra.mxu1 %v3161_v19  ;;  %v2027_v19 = vld [vmem:[#allocation12 + $0xb0] sm:$0xff] }
 0xab6   : > { %3174 = vmatprep.subr.bf16.mxu1 %v3173_v50  ;;  %v2044_v50 = vld [vmem:[#allocation12 + $0x138] sm:$0xff] }
 0xab7   : > { %v3221_v53 = vpack.c.bf16 %v2044_v50, %v2040_v47  ;;  %v2743_v47 = vld [vmem:[%s4505_s17] ss:$0 sm:$0xff]  ;;  %s4414_s17 = scalar_lea.hbm %s4508_s22, %s2751_s13 }
 0xaba   : > { %v3485_v20 = vpop.eup %3484 }
 0xabb   : > { %v1770_v21 = vsel %vm904_vm2, %v3485_v20, 0.0  ;;  %v3487_v22 = vpop.eup %3486 }
 0xabc   : > { %1771 = vadd.xlane.f32.xlu0 %v1770_v21  ;;  %v1773_v62 = vsel %vm904_vm2, %v3487_v22, 0.0  ;;  %v3215_v21 = vpack.c.bf16 %v2027_v19, %v2023_v18  ;;  %v2059_v19 = vld [vmem:[#allocation12 + $0x1b0] sm:$0xff] }
 0xac0   : > { %1774 = vadd.xlane.f32.xlu0 %v1773_v62 }
 0xb49   : > { %v1772_v30 = vpop.xlane.xlu0 %1771 }
 0xb4a   : > { %3488 = vrcp.f32 %v1772_v30  ;;  %v2030_v30 = vld [vmem:[#allocation12 + $0xc8] sm:$0xff] }
 0xb4d   : > { %v1775_v33 = vpop.xlane.xlu0 %1774 }
 0xb4e   : > { %3490 = vrcp.f32 %v1775_v33  ;;  %v2034_v33 = vld [vmem:[#allocation12 + $0xe8] sm:$0xff] }
 0xb54   : > { %v3489_v34 = vpop.eup %3488 }
 0xb55   : > { %v1778_v35 = vmul.f32 %v3489_v34, %v3485_v20  ;;  %v3183_v20 = vpack.c.bf16 %v2025_v17, %v2021_v15  ;;  %v2032_v34 = vld [vmem:[#allocation12 + $0xd8] sm:$0xff]  ;;  %v2053_v15 = vld [vmem:[#allocation12 + $0x180] sm:$0xff]  ;;  %v2055_v17 = vld [vmem:[#allocation12 + $0x190] sm:$0xff] }
 0xb57   : > { %3023 = vmatprep.mubr.msk.f32.mxu1 %vm904_vm2, %v1778_v35  ;;  %v3185_v35 = vpack.c.bf16 %v2034_v33, %v2030_v30  ;;  %v2065_v30 = vld [vmem:[#allocation12 + $0x1e0] sm:$0xff]  ;;  %v2063_v33 = vld [vmem:[#allocation12 + $0x1d0] sm:$0xff] }
 0xb58   : > { %v3491_v36 = vpop.eup %3490 }
 0xb59   : > { %v1779_v37 = vmul.f32 %v3491_v36, %v3487_v22  ;;  %v2036_v36 = vld [vmem:[#allocation12 + $0xf8] sm:$0xff] }
 0xb5b   : > { %3024 = vmatmul.mubr.msk.f32.vlgmr.msra.gmra.mrb[14].mxu1 %vm904_vm2, %v1779_v37  ;;  %v2029_v37 = vld [vmem:[#allocation12 + $0xc0] sm:$0xff] }
 0xb5c   : > { %2155 = vmatprep.mubr.f32.mxu1 %v3803_v6  ;;  %3176 = vmatpush1.bf16.msra.mxu1 %v3175_v55  ;;  %v2039_v55 = vld [vmem:[#allocation12 + $0x110] sm:$0xff] }
 0xb5d   : > { %v3223_v61 = vpack.c.bf16 %v2043_v56, %v2039_v55  ;;  %v2334_v55 = vld [vmem:[#allocation14 + $0x88] sm:$0xff]  ;;  %v2365_v56 = vld [vmem:[#allocation14 + $0x180] sm:$0xff] }
 0xc2e   : > { %v3025_v38 = vpop.f32.mrb[14].mxu1 }
 0xc2f   : > { %v1858_v31 = vpop.f32.mrb[15].mxu1 }
 0xc30   : > { %3034 = vmatprep.mubr.msk.f32.mxu0 %vm816_vm0, %v1858_v31  ;;  %v3217_v31 = vpack.c.bf16 %v2036_v36, %v2032_v34  ;;  %v2067_v34 = vld [vmem:[#allocation12 + $0x1f0] sm:$0xff] }
 0xc31   : > { %3035 = vmatmul.mubr.msk.f32.vlgmr.msra.gmra.mrb[6].mxu0 %vm816_vm0, %v3025_v38  ;;  %v2033_v38 = vld [vmem:[#allocation12 + $0xe0] sm:$0xff]  ;;  %v3235_v36 = vpack.c.bf16 %v2067_v34, %v2063_v33  ;;  %v2371_v33 = vld [vmem:[#allocation14 + $0x1b0] sm:$0xff] }
 0xc32   : > { %2232 = vmatprep.mubr.f32.mxu0 %v3803_v6  ;;  %3208 = vmatpush1.bf16.msra.mxu0 %v3207_v57  ;;  %v2050_v57 = vld [vmem:[#allocation12 + $0x168] sm:$0xff] }
 0xd04   : > { %v3036_v28 = vpop.f32.mrb[6].mxu0 }
 0xd05   : > { %v1943_v49 = vpop.f32.mrb[7].mxu0  ;;  %v1962_v2 = vadd.f32 %v3036_v28, %v2741_v39  ;;  %v2031_v28 = vld [vmem:[#allocation12 + $0xd0] sm:$0xff] }
 0xd06   : > { %v1961_v32 = vadd.f32 %v2741_v39, %v1943_v49  ;;  %v3187_v39 = vpack.c.bf16 %v2033_v38, %v2029_v37  ;;  %v2035_v49 = vld [vmem:[#allocation12 + $0xf0] sm:$0xff] }
 0xd07   : > { %v4313_v45 = vadd.f32 %v1962_v2, %v4170_v1  ;;  %v2020_v1 = vld [vmem:[#allocation12 + $0x78] sm:$0xff]  ;;  %v2038_v2 = vld [vmem:[#allocation12 + $0x108] sm:$0xff] }
 0xd08   : > { %v4309_v44 = vadd.f32 %v1961_v32, %v4167_v0  ;;  %v2014_v0 = vld [vmem:[#allocation12 + $0x48] sm:$0xff]  ;;  %v3209_v3 = vpack.c.bf16 %v2020_v1, %v2016_v60  ;;  %v3219_v32 = vpack.c.bf16 %v2035_v49, %v2031_v28  ;;  %v3189_v48 = vpack.c.bf16 %v2042_v46, %v2038_v2  ;;  %v2052_v1 = vld [vmem:[#allocation12 + $0x178] sm:$0xff] }
 0xd09   : > { %v3177_v63 = vpack.c.bf16 %v2018_v59, %v2014_v0  ;;  %v2046_v0 = vld [vmem:[#allocation12 + $0x148] sm:$0xff]  ;;  %v2048_v59 = vld [vmem:[#allocation12 + $0x158] sm:$0xff] }
 0xd0a   : > { %1967 = vadd.xlane.f32.xlu0 %v4309_v44  ;;  %3210 = vmatprep.subr.bf16.mxu0 %v3209_v3  ;;  %v3193_v60 = vpack.c.bf16 %v2050_v57, %v2046_v0  ;;  %v2049_v3 = vld [vmem:[#allocation12 + $0x160] sm:$0xff]  ;;  %v3225_v4 = vpack.c.bf16 %v2052_v1, %v2048_v59  ;;  %v2742_v2 = vld [vmem:[%s4504_s23] ss:$0 sm:$0xff]  ;;  %v2366_v0 = vld [vmem:[#allocation14 + $0x188] sm:$0xff] }
 0xd0b   : > { %3178 = vmatprep.subr.bf16.mxu1 %v3177_v63  ;;  %3212 = vmatpush1.bf16.msra.mxu0 %v3211_v11  ;;  %v2045_v63 = vld [vmem:[#allocation12 + $0x140] sm:$0xff]  ;;  %v2056_v11 = vld [vmem:[#allocation12 + $0x198] sm:$0xff]  ;;  %v2318_v59 = vld [vmem:[#allocation14 + $0x8] sm:$0xff] }
 0xd0c   : > { %3180 = vmatpush1.bf16.msra.mxu1 %v3179_v8  ;;  %3214 = vmatprep.subr.bf16.mxu0 %v3213_v16  ;;  %v3195_v5 = vpack.c.bf16 %v2049_v3, %v2045_v63  ;;  %v2051_v8 = vld [vmem:[#allocation12 + $0x170] sm:$0xff]  ;;  %v2057_v16 = vld [vmem:[#allocation12 + $0x1a0] sm:$0xff]  ;;  %v2350_v63 = vld [vmem:[#allocation14 + $0x108] sm:$0xff] }
 0xd0d   : > { %3182 = vmatprep.subr.bf16.mxu1 %v3181_v12  ;;  %v3227_v10 = vpack.c.bf16 %v2051_v8, %v2047_v7  ;;  %v2060_v12 = vld [vmem:[#allocation12 + $0x1b8] sm:$0xff]  ;;  %v3199_v18 = vpack.c.bf16 %v2057_v16, %v2053_v15  ;;  %v2317_v57 = vld [vmem:[#allocation14] sm:$0xff]  ;;  %v2338_v16 = vld [vmem:[#allocation14 + $0xa8] sm:$0xff] }
 0xd0e   : > { %1969 = vadd.xlane.f32.xlu0 %v4313_v45  ;;  %v3229_v14 = vpack.c.bf16 %v2060_v12, %v2056_v11  ;;  %v3239_v1 = vpack.c.bf16 %v2318_v59, %v2317_v57  ;;  %v2368_v8 = vld [vmem:[#allocation14 + $0x198] sm:$0xff]  ;;  %v2351_v12 = vld [vmem:[#allocation14 + $0x110] sm:$0xff]  ;;  %v2337_v15 = vld [vmem:[#allocation14 + $0xa0] sm:$0xff] }
 0xd0f   : > { %3216 = vmatpush1.bf16.msra.mxu0 %v3215_v21  ;;  %v2066_v21 = vld [vmem:[#allocation12 + $0x1e8] sm:$0xff]  ;;  %v2376_v59 = vld [vmem:[#allocation14 + $0x1d8] sm:$0xff] }
 0xd10   : > { %3184 = vmatpush1.bf16.msra.mxu1 %v3183_v20  ;;  %3218 = vmatprep.subr.bf16.mxu0 %v3217_v31  ;;  %v2062_v20 = vld [vmem:[#allocation12 + $0x1c8] sm:$0xff] }
 0xd11   : > { %3186 = vmatprep.subr.bf16.mxu1 %v3185_v35 }
 0xd13   : > { %3220 = vmatpush1.bf16.msra.mxu0 %v3219_v32 }
 0xd14   : > { %3188 = vmatpush1.bf16.msra.mxu1 %v3187_v39  ;;  %3222 = vmatprep.subr.bf16.mxu0 %v3221_v53 }
 0xd15   : > { %3190 = vmatprep.subr.bf16.mxu1 %v3189_v48 }
 0xd17   : > { %3224 = vmatpush1.bf16.msra.mxu0 %v3223_v61 }
 0xd18   : > { %3192 = vmatpush1.bf16.msra.mxu1 %v3191_v54  ;;  %3226 = vmatprep.subr.bf16.mxu0 %v3225_v4  ;;  %v2335_v4 = vld [vmem:[#allocation14 + $0x90] sm:$0xff] }
 0xd19   : > { %3194 = vmatprep.subr.bf16.mxu1 %v3193_v60  ;;  %v3269_v60 = vpack.c.bf16 %v2366_v0, %v2365_v56  ;;  %v2343_v56 = vld [vmem:[#allocation14 + $0xd0] sm:$0xff] }
 0xd1a   : > { %v2375_v0 = vld [vmem:[#allocation14 + $0x1d0] sm:$0xff] }
 0xd1b   : > { %3228 = vmatpush1.bf16.msra.mxu0 %v3227_v10  ;;  %v2320_v10 = vld [vmem:[#allocation14 + $0x18] sm:$0xff] }
 0xd1c   : > { %3196 = vmatpush1.bf16.msra.mxu1 %v3195_v5  ;;  %3230 = vmatprep.subr.bf16.mxu0 %v3229_v14  ;;  %v2367_v5 = vld [vmem:[#allocation14 + $0x190] sm:$0xff]  ;;  %v3243_v11 = vpack.c.bf16 %v2320_v10, %v2319_v9  ;;  %v2378_v10 = vld [vmem:[#allocation14 + $0x1e8] sm:$0xff] }
 0xd1d   : > { %3198 = vmatprep.subr.bf16.mxu1 %v3197_v13  ;;  %v3273_v58 = vpack.c.bf16 %v2368_v8, %v2367_v5  ;;  %v2352_v13 = vld [vmem:[#allocation14 + $0x118] sm:$0xff]  ;;  %v2345_v5 = vld [vmem:[#allocation14 + $0xe0] sm:$0xff] }
 0xd1e   : > { %v3275_v14 = vpack.c.bf16 %v2352_v13, %v2351_v12  ;;  %v2377_v8 = vld [vmem:[#allocation14 + $0x1e0] sm:$0xff] }
 0xd1f   : > { %v3293_v12 = vpack.c.bf16 %v2378_v10, %v2377_v8 }
 0xd20   : > { %3200 = vmatpush1.bf16.msra.mxu1 %v3199_v18  ;;  %v3245_v18 = vpack.c.bf16 %v2338_v16, %v2337_v15  ;;  %v2362_v15 = vld [vmem:[#allocation14 + $0x168] sm:$0xff] }
 0xd97   : > { %v1968_v22 = vpop.xlane.xlu0 %1967 }
 0xd98   : > { %v1971_v62 = vmul.f32 0.0078125, %v1968_v22  ;;  %v3231_v22 = vpack.c.bf16 %v2059_v19, %v2055_v17  ;;  %v2369_v17 = vld [vmem:[#allocation14 + $0x1a0] sm:$0xff]  ;;  %v2370_v19 = vld [vmem:[#allocation14 + $0x1a8] sm:$0xff] }
 0xd9a   : > { %v4317_v23 = vsub.f32 %v4309_v44, %v1971_v62  ;;  %v3201_v62 = vpack.c.bf16 %v2066_v21, %v2062_v20  ;;  %3232 = vmatpush1.bf16.msra.mxu0 %v3231_v22  ;;  %v2321_v20 = vld [vmem:[#allocation14 + $0x20] sm:$0xff]  ;;  %v2322_v21 = vld [vmem:[#allocation14 + $0x28] sm:$0xff]  ;;  %v3277_v22 = vpack.c.bf16 %v2370_v19, %v2369_v17  ;;  %v2347_v17 = vld [vmem:[#allocation14 + $0xf0] sm:$0xff] }
 0xd9b   : > { %v1970_v24 = vpop.xlane.xlu0 %1969  ;;  %v2379_v19 = vld [vmem:[#allocation14 + $0x1f0] sm:$0xff] }
 0xd9c   : > { %v1972_v25 = vmul.f32 0.0078125, %v1970_v24  ;;  %v1975_v26 = vmul.f32 %v4317_v23, %v4317_v23  ;;  %v2064_v24 = vld [vmem:[#allocation12 + $0x1d8] sm:$0xff]  ;;  %3202 = vmatprep.subr.bf16.mxu1 %v3201_v62  ;;  %v3247_v62 = vpack.c.bf16 %v2322_v21, %v2321_v20 }
 0xd9d   : > { %v2380_v21 = vld [vmem:[#allocation14 + $0x1f8] sm:$0xff] }
 0xd9e   : > { %v4322_v27 = vsub.f32 %v4313_v45, %v1972_v25  ;;  %1977 = vadd.xlane.f32.xlu0 %v1975_v26  ;;  %v2068_v25 = vld [vmem:[#allocation12 + $0x1f8] sm:$0xff]  ;;  %v2061_v26 = vld [vmem:[#allocation12 + $0x1c0] sm:$0xff] }
 0xd9f   : > { %v3203_v35 = vpack.c.bf16 %v2065_v30, %v2061_v26  ;;  %v2340_v30 = vld [vmem:[#allocation14 + $0xb8] sm:$0xff] }
 0xda0   : > { %v1976_v29 = vmul.f32 %v4322_v27, %v4322_v27 }
 0xda1   : > { %3204 = vmatpush1.bf16.msra.mxu1 %v3203_v35  ;;  %v2372_v35 = vld [vmem:[#allocation14 + $0x1b8] sm:$0xff] }
 0xda2   : > { %1979 = vadd.xlane.f32.xlu0 %v1976_v29  ;;  %v3233_v29 = vpack.c.bf16 %v2068_v25, %v2064_v24  ;;  %v2353_v24 = vld [vmem:[#allocation14 + $0x120] sm:$0xff]  ;;  %v2354_v25 = vld [vmem:[#allocation14 + $0x128] sm:$0xff] }
 0xda3   : > { %v3279_v26 = vpack.c.bf16 %v2354_v25, %v2353_v24  ;;  %v3297_v24 = vpack.c.bf16 %v2380_v21, %v2379_v19 }
 0xda4   : > { %3234 = vmatprep.subr.bf16.mxu0 %v3233_v29  ;;  %v2339_v29 = vld [vmem:[#allocation14 + $0xb0] sm:$0xff] }
 0xda5   : > { %3236 = vmatpush1.bf16.msra.mxu0 %v3235_v36  ;;  %v3249_v34 = vpack.c.bf16 %v2340_v30, %v2339_v29  ;;  %v2323_v36 = vld [vmem:[#allocation14 + $0x30] sm:$0xff]  ;;  %v2364_v29 = vld [vmem:[#allocation14 + $0x178] sm:$0xff] }
 0xda6   : > { %3270 = vmatprep.subr.bf16.mxu0 %v3269_v60  ;;  %v2327_v60 = vld [vmem:[#allocation14 + $0x50] sm:$0xff] }
 0xe2b   : > { %v1978_v37 = vpop.xlane.xlu0 %1977 }
 0xe2c   : > { %v1981_v38 = vmul.f32 0.0078125, %v1978_v37  ;;  %v2324_v37 = vld [vmem:[#allocation14 + $0x38] sm:$0xff] }
 0xe2e   : > { %v1983_v31 = vadd.f32 1e-05, %v1981_v38  ;;  %v3281_v38 = vpack.c.bf16 %v2372_v35, %v2371_v33  ;;  %v2069_v33 = vld [vmem:[%s4506_s30] sm:$0xf]  ;;  %s3716_s30 = scalar_lea.vmem %s3715_s24, 512 }
 0xe2f   : > { %v1980_v39 = vpop.xlane.xlu0 %1979  ;;  %v2074_v35 = vrot.slane %v2069_v33, %v637_v41  ;;  %p3718_p3 = scmp.lt.s32.totalorder %s3716_s30, %s3710_s15 }
 0xe30   : > { %3492 = vrsqrt.f32 %v1983_v31  ;;  %v1982_v28 = vmul.f32 0.0078125, %v1980_v39  ;;  %v3251_v31 = vpack.c.bf16 %v2324_v37, %v2323_v36  ;;  %v2355_v39 = vld [vmem:[#allocation14 + $0x130] sm:$0xff]  ;;  %v2082_v36 = vrot.slane %v2069_v33, %v645_v42 }
 0xe31   : > { %v2078_v37 = vrot.slane %v2069_v33, %v641_v43  ;;  %p3719_p2 = por %p3718_p3, %p3717_p1 }
 0xe32   : > { %v1984_v49 = vadd.f32 1e-05, %v1982_v28  ;;  %v2356_v28 = vld [vmem:[#allocation14 + $0x138] sm:$0xff] }
 0xe33   : > { %p3720_p8 = pnand %p3719_p2, %p3713_p13 }
 0xe34   : > { %3494 = vrsqrt.f32 %v1984_v49  ;;  %v3283_v49 = vpack.c.bf16 %v2356_v28, %v2355_v39 }
 0xe3a   : > { %v3493_v32 = vpop.eup %3492 }
 0xe3b   : > { %v1987_v46 = vmul.f32 %v3493_v32, %v4317_v23  ;;  %v2333_v23 = vld [vmem:[#allocation14 + $0x80] sm:$0xff] }
 0xe3c   : > { %v3237_v61 = vpack.c.bf16 %v2334_v55, %v2333_v23  ;;  %v2341_v32 = vld [vmem:[#allocation14 + $0xc0] sm:$0xff]  ;;  %v2358_v23 = vld [vmem:[#allocation14 + $0x148] sm:$0xff] }
 0xe3d   : > { %v1995_v48 = vmul.f32 %v2742_v2, %v1987_v46  ;;  %v2373_v46 = vld [vmem:[#allocation14 + $0x1c0] sm:$0xff] }
 0xe3e   : > { %v3495_v50 = vpop.eup %3494  ;;  %3238 = vmatprep.subr.bf16.mxu1 %v3237_v61  ;;  %v2344_v61 = vld [vmem:[#allocation14 + $0xd8] sm:$0xff] }
 0xe3f   : > { %v2003_v51 = vadd.f32 %v2743_v47, %v1995_v48  ;;  %v1988_v52 = vmul.f32 %v3495_v50, %v4322_v27  ;;  %v2349_v27 = vld [vmem:[#allocation14 + $0x100] sm:$0xff]  ;;  %v2374_v48 = vld [vmem:[#allocation14 + $0x1c8] sm:$0xff]  ;;  %v3257_v57 = vpack.c.bf16 %v2344_v61, %v2343_v56 }
 0xe40   : > { %v3271_v3 = vpack.c.bf16 %v2350_v63, %v2349_v27  ;;  %v2325_v50 = vld [vmem:[#allocation14 + $0x40] sm:$0xff]  ;;  %v3289_v27 = vpack.c.bf16 %v2376_v59, %v2375_v0 }
 0xe41   : > { %2156 = vmatmul.mubr.f32.vlgmr.msra.gmra.mrb[16].mxu1 %v2003_v51  ;;  %2233 = vmatmul.mubr.f32.vlgmr.msra.gmra.mrb[8].mxu0 %v2003_v51  ;;  %v1996_v53 = vmul.f32 %v2742_v2, %v1988_v52  ;;  %v2342_v2 = vld [vmem:[#allocation14 + $0xc8] sm:$0xff]  ;;  %v3285_v52 = vpack.c.bf16 %v2374_v48, %v2373_v46 }
 0xe42   : > { %2161 = vmatprep.mubr.f32.mxu1 %v3803_v6  ;;  %2238 = vmatprep.mubr.f32.mxu0 %v3803_v6  ;;  %v2336_v6 = vld [vmem:[#allocation14 + $0x98] sm:$0xff]  ;;  %v2326_v51 = vld [vmem:[#allocation14 + $0x48] sm:$0xff] }
 0xe43   : > { %v2004_v54 = vadd.f32 %v2743_v47, %v1996_v53  ;;  %3240 = vmatpush3.bf16.msra.mxu1 %v3239_v1  ;;  %3272 = vmatpush3.bf16.msra.mxu0 %v3271_v3  ;;  %v3241_v7 = vpack.c.bf16 %v2336_v6, %v2335_v4  ;;  %v3253_v47 = vpack.c.bf16 %v2342_v2, %v2341_v32  ;;  %v2328_v1 = vld [vmem:[#allocation14 + $0x58] sm:$0xff]  ;;  %v2359_v3 = vld [vmem:[#allocation14 + $0x150] sm:$0xff] }
 0xe44   : > { %3274 = vmatprep.subr.bf16.mxu0 %v3273_v58  ;;  %v3255_v53 = vpack.c.bf16 %v2326_v51, %v2325_v50  ;;  %v3259_v63 = vpack.c.bf16 %v2328_v1, %v2327_v60  ;;  %v2360_v4 = vld [vmem:[#allocation14 + $0x158] sm:$0xff]  ;;  %v2329_v58 = vld [vmem:[#allocation14 + $0x60] sm:$0xff] }
 0xe45   : > { %2162 = vmatmul.mubr.f32.gmra.mrb[18].mxu1 %v2004_v54  ;;  %2239 = vmatmul.mubr.f32.gmra.mrb[10].mxu0 %v2004_v54  ;;  %v2357_v54 = vld [vmem:[#allocation14 + $0x140] sm:$0xff]  ;;  %v3291_v6 = vpack.c.bf16 %v2360_v4, %v2359_v3 }
 0xe46   : > { %3242 = vmatprep.subr.bf16.mxu1 %v3241_v7  ;;  %v3287_v55 = vpack.c.bf16 %v2358_v23, %v2357_v54  ;;  %v2346_v7 = vld [vmem:[#allocation14 + $0xe8] sm:$0xff] }
 0xe47   : > { %3244 = vmatpush3.bf16.msra.mxu1 %v3243_v11  ;;  %3276 = vmatpush3.bf16.msra.mxu0 %v3275_v14  ;;  %v3261_v9 = vpack.c.bf16 %v2346_v7, %v2345_v5  ;;  %v2330_v11 = vld [vmem:[#allocation14 + $0x68] sm:$0xff]  ;;  %v2361_v14 = vld [vmem:[#allocation14 + $0x160] sm:$0xff] }
 0xe48   : > { %3246 = vmatprep.subr.bf16.mxu1 %v3245_v18  ;;  %3278 = vmatprep.subr.bf16.mxu0 %v3277_v22  ;;  %v3263_v13 = vpack.c.bf16 %v2330_v11, %v2329_v58  ;;  %v3295_v16 = vpack.c.bf16 %v2362_v15, %v2361_v14  ;;  %v2348_v18 = vld [vmem:[#allocation14 + $0xf8] sm:$0xff]  ;;  %v2331_v22 = vld [vmem:[#allocation14 + $0x70] sm:$0xff] }
 0xe49   : > { %v3265_v20 = vpack.c.bf16 %v2348_v18, %v2347_v17 }
 0xe4b   : > { %3248 = vmatpush3.bf16.msra.mxu1 %v3247_v62  ;;  %3280 = vmatpush3.bf16.msra.mxu0 %v3279_v26  ;;  %v2332_v62 = vld [vmem:[#allocation14 + $0x78] sm:$0xff]  ;;  %v2363_v26 = vld [vmem:[#allocation14 + $0x170] sm:$0xff] }
 0xe4c   : > { %3250 = vmatprep.subr.bf16.mxu1 %v3249_v34  ;;  %3282 = vmatprep.subr.bf16.mxu0 %v3281_v38  ;;  %v3267_v25 = vpack.c.bf16 %v2332_v62, %v2331_v22  ;;  %v3299_v30 = vpack.c.bf16 %v2364_v29, %v2363_v26  ;;  %v2085_v34 = vsub.s32 3, %v4187_v40 }
 0xe4e   : > { %v2086_v38 = vrot.slane %v2069_v33, %v2085_v34 }
 0xe4f   : > { %3252 = vmatpush3.bf16.msra.mxu1 %v3251_v31  ;;  %3284 = vmatpush3.bf16.msra.mxu0 %v3283_v49 }
 0xe50   : > { %3254 = vmatprep.subr.bf16.mxu1 %v3253_v47  ;;  %3286 = vmatprep.subr.bf16.mxu0 %v3285_v52 }
 0xe53   : > { %3256 = vmatpush3.bf16.msra.mxu1 %v3255_v53  ;;  %3288 = vmatpush3.bf16.msra.mxu0 %v3287_v55 }
 0xe54   : > { %3258 = vmatprep.subr.bf16.mxu1 %v3257_v57  ;;  %3290 = vmatprep.subr.bf16.mxu0 %v3289_v27 }
 0xe57   : > { %3260 = vmatpush3.bf16.msra.mxu1 %v3259_v63  ;;  %3292 = vmatpush3.bf16.msra.mxu0 %v3291_v6 }
 0xe58   : > { %3262 = vmatprep.subr.bf16.mxu1 %v3261_v9  ;;  %3294 = vmatprep.subr.bf16.mxu0 %v3293_v12 }
 0xe5b   : > { %3264 = vmatpush3.bf16.msra.mxu1 %v3263_v13  ;;  %3296 = vmatpush3.bf16.msra.mxu0 %v3295_v16 }
 0xe5c   : > { %3266 = vmatprep.subr.bf16.mxu1 %v3265_v20  ;;  %3298 = vmatprep.subr.bf16.mxu0 %v3297_v24 }
 0xe5f   : > { %3268 = vmatpush3.bf16.msra.mxu1 %v3267_v25  ;;  %3300 = vmatpush3.bf16.msra.mxu0 %v3299_v30 }
 0xf14   : > { %v2157_v31 = vpop.f32.mrb[16].mxu1  ;;  %v2234_v39 = vpop.f32.mrb[8].mxu0 }
 0xf15   : > { %v4346_v28 = vadd.f32 %v2157_v31, %v2074_v35  ;;  %v4348_v49 = vadd.f32 %v2234_v39, %v2082_v36  ;;  %v2159_v32 = vpop.f32.mrb[17].mxu1  ;;  %v2236_v2 = vpop.f32.mrb[9].mxu0 }
 0xf16   : > { %v4350_v46 = vadd.f32 %v2159_v32, %v2078_v37  ;;  %v4352_v47 = vadd.f32 %v2236_v2, %v2086_v38 }
 0xf17   : > { %v2245_v41 = vmul.f32 %v4346_v28, %v4346_v28  ;;  %v2247_v40 = vmul.f32 %v4348_v49, %v4348_v49 }
 0xf18   : > { %v2246_v42 = vmul.f32 %v4350_v46, %v4350_v46  ;;  %v2248_v43 = vmul.f32 %v4352_v47, %v4352_v47  ;;  %v2163_v48 = vpop.f32.mrb[18].mxu1  ;;  %v2240_v50 = vpop.f32.mrb[10].mxu0 }
 0xf19   : > { %v2253_v51 = vmul.f32 %v2245_v41, %v4346_v28  ;;  %v2255_v52 = vmul.f32 %v2247_v40, %v4348_v49  ;;  %v4364_v53 = vadd.f32 %v2163_v48, %v2074_v35  ;;  %v4366_v54 = vadd.f32 %v2240_v50, %v2082_v36  ;;  %v2165_v23 = vpop.f32.mrb[19].mxu1  ;;  %v2242_v55 = vpop.f32.mrb[11].mxu0 }
 0xf1a   : > { %v2254_v56 = vmul.f32 %v2246_v42, %v4350_v46  ;;  %v2256_v61 = vmul.f32 %v2248_v43, %v4352_v47  ;;  %v4370_v0 = vadd.f32 %v2165_v23, %v2078_v37  ;;  %v4372_v57 = vadd.f32 %v2242_v55, %v2086_v38 }
 0xf1b   : > { %v2261_v59 = vmul.f32 0.044715, %v2253_v51  ;;  %v2263_v60 = vmul.f32 0.044715, %v2255_v52  ;;  %v2249_v1 = vmul.f32 %v4364_v53, %v4364_v53  ;;  %v2251_v27 = vmul.f32 %v4366_v54, %v4366_v54 }
 0xf1c   : > { %v2262_v63 = vmul.f32 0.044715, %v2254_v56  ;;  %v2264_v3 = vmul.f32 0.044715, %v2256_v61  ;;  %v2250_v4 = vmul.f32 %v4370_v0, %v4370_v0  ;;  %v2252_v6 = vmul.f32 %v4372_v57, %v4372_v57 }
 0xf1d   : > { %v2269_v5 = vadd.f32 %v2261_v59, %v4346_v28  ;;  %v2271_v7 = vadd.f32 %v2263_v60, %v4348_v49  ;;  %v2257_v8 = vmul.f32 %v2249_v1, %v4364_v53  ;;  %v2259_v9 = vmul.f32 %v2251_v27, %v4366_v54 }
 0xf1e   : > { %v2270_v10 = vadd.f32 %v2262_v63, %v4350_v46  ;;  %v2272_v58 = vadd.f32 %v2264_v3, %v4352_v47  ;;  %v2258_v11 = vmul.f32 %v2250_v4, %v4370_v0  ;;  %v2260_v12 = vmul.f32 %v2252_v6, %v4372_v57 }
 0xf1f   : > { %v2277_v13 = vmul.f32 0.7978846, %v2269_v5  ;;  %v2279_v14 = vmul.f32 0.7978846, %v2271_v7  ;;  %v2265_v15 = vmul.f32 0.044715, %v2257_v8 }
 0xf20   : > { %v2278_v16 = vmul.f32 0.7978846, %v2270_v10  ;;  %v2280_v17 = vmul.f32 0.7978846, %v2272_v58  ;;  %v2267_v18 = vmul.f32 0.044715, %v2259_v9 }
 0xf21   : > { %3496 = vtanh.f32 %v2277_v13  ;;  %v2273_v19 = vadd.f32 %v2265_v15, %v4364_v53  ;;  %v2266_v20 = vmul.f32 0.044715, %v2258_v11  ;;  %v2268_v21 = vmul.f32 0.044715, %v2260_v12  ;;  %v2744_v5 = vld [vmem:[%s4507_s18] ss:$0 sm:$0xff] }
 0xf22   : > { %3498 = vtanh.f32 %v2279_v14  ;;  %v2275_v22 = vadd.f32 %v2267_v18, %v4366_v54 }
 0xf23   : > { %v2281_v62 = vmul.f32 0.7978846, %v2273_v19  ;;  %v2274_v24 = vadd.f32 %v2266_v20, %v4370_v0  ;;  %v2276_v25 = vadd.f32 %v2268_v21, %v4372_v57  ;;  %3500 = vtanh.f32 %v2278_v16 }
 0xf24   : > { %v2283_v26 = vmul.f32 0.7978846, %v2275_v22  ;;  %3502 = vtanh.f32 %v2280_v17 }
 0xf25   : > { %v2282_v29 = vmul.f32 0.7978846, %v2274_v24  ;;  %v2284_v30 = vmul.f32 0.7978846, %v2276_v25  ;;  %3504 = vtanh.f32 %v2281_v62 }
 0xf26   : > { %3506 = vtanh.f32 %v2283_v26 }
 0xf27   : > { %3508 = vtanh.f32 %v2282_v29 }
 0xf28   : > { %3510 = vtanh.f32 %v2284_v30 }
 0xf2b   : > { %v3497_v33 = vpop.eup %3496 }
 0xf2c   : > { %v3499_v34 = vpop.eup %3498  ;;  %v2293_v35 = vadd.f32 1.0, %v3497_v33 }
 0xf2d   : > { %v3501_v36 = vpop.eup %3500  ;;  %v2295_v37 = vadd.f32 1.0, %v3499_v34 }
 0xf2e   : > { %v3503_v38 = vpop.eup %3502  ;;  %v2294_v31 = vadd.f32 1.0, %v3501_v36  ;;  %v2301_v32 = vmul.f32 0.5, %v2293_v35 }
 0xf2f   : > { %v3505_v39 = vpop.eup %3504  ;;  %v2296_v2 = vadd.f32 1.0, %v3503_v38  ;;  %v2303_v40 = vmul.f32 0.5, %v2295_v37 }
 0xf30   : > { %v3507_v41 = vpop.eup %3506  ;;  %v2302_v42 = vmul.f32 0.5, %v2294_v31  ;;  %v2297_v43 = vadd.f32 1.0, %v3505_v39  ;;  %v2309_v56 = vmul.f32 %v2301_v32, %v4346_v28 }
 0xf31   : > { %v3509_v48 = vpop.eup %3508  ;;  %v2304_v50 = vmul.f32 0.5, %v2296_v2  ;;  %v2299_v51 = vadd.f32 1.0, %v3507_v41  ;;  %v2311_v1 = vmul.f32 %v2303_v40, %v4348_v49 }
 0xf32   : > { %v3511_v52 = vpop.eup %3510  ;;  %v2310_v23 = vmul.f32 %v2302_v42, %v4350_v46  ;;  %v2298_v55 = vadd.f32 1.0, %v3509_v48  ;;  %v2305_v60 = vmul.f32 0.5, %v2297_v43 }
 0xf33   : > { %v2312_v61 = vmul.f32 %v2304_v50, %v4352_v47  ;;  %v2300_v59 = vadd.f32 1.0, %v3511_v52  ;;  %v2307_v63 = vmul.f32 0.5, %v2299_v51 }
 0xf34   : > { %2452 = vmatprep.mubr.f32.mxu1 %v2310_v23  ;;  %v2306_v27 = vmul.f32 0.5, %v2298_v55  ;;  %v2313_v6 = vmul.f32 %v2305_v60, %v4364_v53 }
 0xf35   : > { %2527 = vmatprep.mubr.f32.mxu0 %v2312_v61  ;;  %2453 = vmatmul.mubr.f32.vlgmr.msra.gmra.mrb[20].mxu1 %v2309_v56  ;;  %v2308_v3 = vmul.f32 0.5, %v2300_v59  ;;  %v2315_v28 = vmul.f32 %v2307_v63, %v4366_v54 }
 0xf36   : > { %2528 = vmatmul.mubr.f32.vlgmr.msra.gmra.mrb[12].mxu0 %v2311_v1  ;;  %v2314_v4 = vmul.f32 %v2306_v27, %v4370_v0 }
 0xf37   : > { %v2316_v46 = vmul.f32 %v2308_v3, %v4372_v57 }
 0xf38   : > { %2457 = vmatprep.mubr.f32.mxu1 %v2314_v4 }
 0xf39   : > { %2532 = vmatprep.mubr.f32.mxu0 %v2316_v46  ;;  %2458 = vmatmul.mubr.f32.gmra.mrb[22].mxu1 %v2313_v6 }
 0xf3a   : > { %2533 = vmatmul.mubr.f32.gmra.mrb[14].mxu0 %v2315_v28 }
0x1008   : > { %v2858_v49 = vpop.f32.mrb[20].mxu1 }
0x1009   : > { %v2896_v47 = vpop.f32.mrb[12].mxu0  ;;  %v2859_v7 = vpop.f32.mrb[21].mxu1 }
0x100a   : > { %v2860_v0 = vadd.f32 %v2859_v7, %v2858_v49  ;;  %v2897_v8 = vpop.f32.mrb[13].mxu0 }
0x100b   : > { %v2898_v57 = vadd.f32 %v2897_v8, %v2896_v47 }
0x100c   : > { %v2455_v9 = vadd.f32 %v2860_v0, %v2744_v5  ;;  %v2861_v53 = vpop.f32.mrb[22].mxu1 }
0x100d   : > { %v2899_v10 = vpop.f32.mrb[14].mxu0  ;;  %v2862_v58 = vpop.f32.mrb[23].mxu1 }
0x100e   : > { %v2530_v54 = vadd.f32 %v2898_v57, %v2455_v9  ;;  %v2863_v11 = vadd.f32 %v2862_v58, %v2861_v53  ;;  %v2900_v12 = vpop.f32.mrb[15].mxu0 }
0x100f   : > { %v2901_v13 = vadd.f32 %v2900_v12, %v2899_v10 }
0x1010   : > { %v2538_v14 = vadd.f32 %v2530_v54, %v4309_v44  ;;  %v2460_v15 = vadd.f32 %v2863_v11, %v2744_v5 }
0x1012   : > { %2540 = vst [vmem:[%s541_s20] sm:$0xff] %v2538_v14  ;;  %v2535_v16 = vadd.f32 %v2901_v13, %v2460_v15 }
0x1014   : > { %v2539_v17 = vadd.f32 %v2535_v16, %v4313_v45 }
0x1016   : > { %2541 = vst [vmem:[%s541_s20 + $0x8] sm:$0xff] %v2539_v17 }
0x1017   : > { %3723 = shalt.err (!%p3720_p8)
}
0x1018   : > { %s3724_s3 = scalar_lea.hbm %s4414_s17, 256  ;;  %s3728_s20 = scalar_lea.hbm %s4508_s22, 512 }
0x1019   : > { %p3725_p10 = scmp.ne.s32.totalorder %s4414_s17, %s3724_s3  ;;  %p3729_p0 = scmp.lt.u32.totalorder %s4414_s17, %s4508_s22 }
0x101a   : > { %p3730_p5 = scmp.lt.u32.totalorder %s3728_s20, %s3724_s3  ;;  %p3732_p6 = scmp.lt.u32.totalorder %s3724_s3, %s4414_s17 }
0x101b   : > { %p3726_p11 = pnand %p3725_p10, %p4509_p9 }
0x101c   : > { %p3731_p7 = por %p3730_p5, %p3729_p0 }
0x101d   : > { %p3727_p12 = pneg %p3726_p11 }
0x101e   : > { %p3733_p4 = por %p3732_p6, %p3731_p7 }
0x1020   : > { %p3734_p13 = pnand %p3733_p4, %p3727_p12 }
0x1022   : > { %3737 = shalt.err (!%p3734_p13)
}
0x1023   : > { %s3808_s19 = smov 128   ;;  %s3809_s15 = smov 8  }
0x1024   : > { %3333 = dma.vmem_to_hbm [thread:$0]  (%p4509_p9), %s4409_s7, 256, %s4414_s17, %s2543_s1, %s3808_s19, %s3808_s19, %s3809_s15  }
0x1025 PF: > { %s2571_s14 = sand.u32 1, %s3776_s25   ;;  %p4510_p1 = scmp.ne.s32.totalorder %s4493_s12, 0 }
0x1026   : > { %p4511_p3 = scmp.ge.s32.totalorder %s3788_s28, 2  ;;  %s2572_s24 = scalar_lea.sflag [#allocation5], %s2571_s14 }
0x1028   : > { %p3359_p2 = pnand %p4511_p3, %p4510_p1 }
0x102a   : > { %3771 = dma.done.wait (!%p3359_p2), %s2572_s24, 256  }
0x102b   : > { %3773 = vsyncadd (!%p3359_p2), %s2572_s24, 4294967040  ;;  %p29_p8 = scmp.ge.s32.totalorder %s4063_s16, 4   ;;  %s4512_s25 = smov %s3780_s26 }
0x102c   : > { %s4513_s26 = smov %s3784_s27  ;;  %s4514_s27 = smov %s4074_s10 }
0x102d   : > { %s4515_s28 = smov %s4063_s16  ;;  %31 = sbr.rel (!%p29_p8) target bundleno = 16 (0x10), region = 141 }
0x1034   :  { %2577 = vsyncpa [#allocation4], 1 }
0x1035   :  { %2579 = vsyncpa [#allocation4 + $0x1], 1 }
0x1036   :  { %2580 = vsyncpa [#allocation7], 1 }
0x1037   :  { %2581 = vsyncpa [#allocation10], 1 }
0x1038   :  { %2582 = vsyncpa [#allocation13], 1 }
0x1039   :  { %2583 = vsyncpa [#allocation5], 1 }
0x103a   :  { %2585 = vsyncpa [#allocation5 + $0x1], 1 }

</bundles_post_ra>
